<compile_context>
chip_gen: v7x
topology: tpu7x:2x2x1
jax: 0.10.0
libtpu: 0.0.40
codegen_flags: <defaults>
</compile_context>

<pallas_src>
import jax
import jax.numpy as jnp
from jax.experimental import pallas as pl
from jax.experimental.pallas import tpu as pltpu

HID = 4            # per-LSTM hidden size (fixed by the module)
DENSE_SCALE = 20   # encoder_dense_scale
LANE = 128


def _align8(n):
    return ((n + 7) // 8) * 8


# ---------------------------------------------------------------------------
# Slab layouts (row offsets shared by host packing and kernel slicing).
# ---------------------------------------------------------------------------
def _slab_r_layout(S):
    """Recurrence slab: block-diag layer-0 input proj, fused recurrent
    weights/biases, merged linearH/linearL weight."""
    H2 = 2 * HID
    off = {}
    r = 0
    off["w0blk"] = r; r = _align8(r + 2 * S)       # (2S, 32S) block-diagonal
    off["b0"] = r;    r = _align8(r + 1)           # (1, 32S) tiled gate bias
    off["whh0"] = r;  r = _align8(r + H2)          # (8, 32)
    off["w1cat"] = r; r = _align8(r + 2 * H2)      # (16, 32) = [wih1; whh1]
    off["b1"] = r;    r = _align8(r + 1)           # (1, 32)
    off["whl"] = r;   r = _align8(r + H2 * S)      # (8S, 256) merged linearH/L
    off["bhl"] = r;   r = _align8(r + 1)           # (1, 256)
    off["rows"] = r
    return off


def _slab_d_layout(S):
    """Dense-stack slab: linear_passthrough, linear1/2, split linear3."""
    d2 = DENSE_SCALE * 2
    d4 = DENSE_SCALE * 4
    off = {}
    r = 0
    off["wp"] = r;  r = _align8(r + 2 * S)         # (2S, 40)
    off["bp"] = r;  r = _align8(r + 1)
    off["w1"] = r;  r = _align8(r + 2 ** 8)        # (256, 80)
    off["b1"] = r;  r = _align8(r + 1)
    off["w2"] = r;  r = _align8(r + d4)            # (80, 40)
    off["b2"] = r;  r = _align8(r + 1)
    off["w3a"] = r; r = _align8(r + d2)            # (40, emb_pad)  (x2 rows)
    off["w3b"] = r; r = _align8(r + d2)            # (40, emb_pad)  (other rows)
    off["b3"] = r;  r = _align8(r + 1)
    off["rows"] = r
    return off


# ---------------------------------------------------------------------------
# Kernel
# ---------------------------------------------------------------------------
def _encoder_kernel(xflat_ref, slabR_ref, slabD_ref, out_ref):
    B = xflat_ref.shape[0]
    S = xflat_ref.shape[1] // 2
    H2 = 2 * HID              # fused hidden width (H | L) = 8
    G = 4 * H2                # fused gate width = 32
    XC = 2 ** 8               # linear1 input width = 256
    D2 = DENSE_SCALE * 2      # 40
    D4 = DENSE_SCALE * 4      # 80
    emb_pad = out_ref.shape[1]

    lr = _slab_r_layout(S)
    ld = _slab_d_layout(S)

    xflat = xflat_ref[...]                                        # (B, 2S)

    # ---- Hoisted layer-0 input projection for ALL timesteps (one matmul,
    # off the serial recurrence path). Bias b0 folded in.
    w0blk = slabR_ref[lr["w0blk"]:lr["w0blk"] + 2 * S, 0:G * S]   # (2S, 32S)
    b0all = slabR_ref[lr["b0"]:lr["b0"] + 1, 0:G * S]             # (1, 32S)
    x0p_all = jnp.dot(xflat, w0blk,
                      preferred_element_type=jnp.float32) + b0all  # (B, 32S)

    # Hoisted recurrent weights / pre-broadcast biases (used every timestep).
    whh0 = slabR_ref[lr["whh0"]:lr["whh0"] + H2, 0:G]             # (8, 32)
    w1cat = slabR_ref[lr["w1cat"]:lr["w1cat"] + 2 * H2, 0:G]      # (16, 32)
    b1b = jnp.broadcast_to(slabR_ref[lr["b1"]:lr["b1"] + 1, 0:G], (B, G))
    bhl = slabR_ref[lr["bhl"]:lr["bhl"] + 1, 0:XC]                # (1, 256)

    def gates_to_hc(g, c):
        # Fused gate tensor (B, 32): per gate, H lanes then L lanes.
        i = jax.nn.sigmoid(g[:, 0 * H2:1 * H2])
        f = jax.nn.sigmoid(g[:, 1 * H2:2 * H2])
        gg = jnp.tanh(g[:, 2 * H2:3 * H2])
        o = jax.nn.sigmoid(g[:, 3 * H2:4 * H2])
        c_new = f * c + i * gg
        return o * jnp.tanh(c_new), c_new

    h0 = jnp.zeros((B, H2), jnp.float32)
    c0 = jnp.zeros((B, H2), jnp.float32)
    h1 = jnp.zeros((B, H2), jnp.float32)
    c1 = jnp.zeros((B, H2), jnp.float32)
    # Accumulator for merged linearH/linearL, bias folded in up front.
    xc_pre = jnp.broadcast_to(bhl, (B, XC))

    for t in range(S):  # S is small & static -> unrolled
        # Layer 0: only the h-recurrent dot sits on the serial path now.
        g0 = x0p_all[:, G * t:G * (t + 1)] + jnp.dot(
            h0, whh0, preferred_element_type=jnp.float32)
        h0, c0 = gates_to_hc(g0, c0)
        # Layer 1: single fused dot ([h0 | h1] @ [wih1; whh1]).
        g1 = jnp.dot(jnp.concatenate([h0, h1], axis=1), w1cat,
                     preferred_element_type=jnp.float32) + b1b
        h1, c1 = gates_to_hc(g1, c1)
        # linearH/L partial for this timestep: depends only on h1(t), so it is
        # free MXU filler during the EUP-heavy recurrence.
        whl_t = slabR_ref[lr["whl"] + H2 * t: lr["whl"] + H2 * (t + 1), 0:XC]
        xc_pre = xc_pre + jnp.dot(h1, whl_t,
                                  preferred_element_type=jnp.float32)

    xc = jnp.tanh(xc_pre)                                          # (B, 256)

    # ---- Dense stack (all weights carved from the dense slab).
    wp = slabD_ref[ld["wp"]:ld["wp"] + 2 * S, 0:D2]
    bp = slabD_ref[ld["bp"]:ld["bp"] + 1, 0:D2]
    other = jnp.dot(xflat, wp, preferred_element_type=jnp.float32) + bp

    w1 = slabD_ref[ld["w1"]:ld["w1"] + XC, 0:D4]
    b1d = slabD_ref[ld["b1"]:ld["b1"] + 1, 0:D4]
    x1 = jnp.tanh(jnp.dot(xc, w1, preferred_element_type=jnp.float32) + b1d)

    w2 = slabD_ref[ld["w2"]:ld["w2"] + D4, 0:D2]
    b2d = slabD_ref[ld["b2"]:ld["b2"] + 1, 0:D2]
    x2 = jnp.tanh(jnp.dot(x1, w2, preferred_element_type=jnp.float32) + b2d)

    # Split linear3: tanh(x2 @ w3a + other @ w3b + b3), padded to 128 lanes.
    w3a = slabD_ref[ld["w3a"]:ld["w3a"] + D2, 0:emb_pad]
    w3b = slabD_ref[ld["w3b"]:ld["w3b"] + D2, 0:emb_pad]
    b3 = slabD_ref[ld["b3"]:ld["b3"] + 1, 0:emb_pad]
    out_ref[...] = jnp.tanh(
        jnp.dot(x2, w3a, preferred_element_type=jnp.float32)
        + jnp.dot(other, w3b, preferred_element_type=jnp.float32)
        + b3)


# ---------------------------------------------------------------------------
# Parameters (deterministic synthetic init, PyTorch shapes)
# ---------------------------------------------------------------------------
def make_params(key, seq_len, embedding_dim=64):
    S = seq_len
    ks = iter(jax.random.split(key, 40))

    def u(shape, scale=0.1):
        return jax.random.uniform(next(ks), shape, jnp.float32, -scale, scale)

    def lstm2():
        return dict(
            wih0=u((4 * HID, 1)), whh0=u((4 * HID, HID)),
            bih0=u((4 * HID,)),   bhh0=u((4 * HID,)),
            wih1=u((4 * HID, HID)), whh1=u((4 * HID, HID)),
            bih1=u((4 * HID,)),     bhh1=u((4 * HID,)),
        )

    return dict(
        rnnH=lstm2(),
        rnnL=lstm2(),
        lin_pass=dict(w=u((DENSE_SCALE * 2, 2 * S)), b=u((DENSE_SCALE * 2,))),
        linH=dict(w=u((2 ** 7, 4 * S)), b=u((2 ** 7,))),
        linL=dict(w=u((2 ** 7, 4 * S)), b=u((2 ** 7,))),
        lin1=dict(w=u((DENSE_SCALE * 4, 2 ** 8)), b=u((DENSE_SCALE * 4,))),
        lin2=dict(w=u((DENSE_SCALE * 2, DENSE_SCALE * 4)), b=u((DENSE_SCALE * 2,))),
        lin3=dict(w=u((embedding_dim, DENSE_SCALE * 4)), b=u((embedding_dim,))),
    )


# ---------------------------------------------------------------------------
# Host-side weight fusion + slab packing (done once, outside the kernel)
# ---------------------------------------------------------------------------
def _fuse_lstm_w(wHt, wLt):
    """Block-structured fused gate weight.

    wHt: (in_H, 4*HID), wLt: (in_L, 4*HID), gate-blocked [i, f, g, o].
    Output (in_H + in_L, 4*2*HID): per gate, first HID cols = H contribution
    (rows :in_H only), next HID cols = L contribution (rows in_H:).
    """
    in_h, in_l = wHt.shape[0], wLt.shape[0]
    out = jnp.zeros((in_h + in_l, 4 * 2 * HID), jnp.float32)
    for g in range(4):
        out = out.at[:in_h, (2 * g) * HID:(2 * g + 1) * HID].set(
            wHt[:, g * HID:(g + 1) * HID])
        out = out.at[in_h:, (2 * g + 1) * HID:(2 * g + 2) * HID].set(
            wLt[:, g * HID:(g + 1) * HID])
    return out


def _fuse_lstm_b(bH, bL):
    parts = []
    for g in range(4):
        parts.append(bH[g * HID:(g + 1) * HID])
        parts.append(bL[g * HID:(g + 1) * HID])
    return jnp.concatenate(parts)[None, :]          # (1, 4*2*HID)


def _pack_slabs(p, S, embedding_dim):
    H2 = 2 * HID
    G = 4 * H2
    XC = 2 ** 8
    d2 = DENSE_SCALE * 2
    d4 = DENSE_SCALE * 4
    rH, rL = p["rnnH"], p["rnnL"]

    wih0 = _fuse_lstm_w(rH["wih0"].T, rL["wih0"].T)                   # (2, 32)
    whh0 = _fuse_lstm_w(rH["whh0"].T, rL["whh0"].T)                   # (8, 32)
    b0 = _fuse_lstm_b(rH["bih0"] + rH["bhh0"], rL["bih0"] + rL["bhh0"])
    wih1 = _fuse_lstm_w(rH["wih1"].T, rL["wih1"].T)                   # (8, 32)
    whh1 = _fuse_lstm_w(rH["whh1"].T, rL["whh1"].T)                   # (8, 32)
    b1 = _fuse_lstm_b(rH["bih1"] + rH["bhh1"], rL["bih1"] + rL["bhh1"])

    # Block-diagonal layer-0 input projection: rows 2t:2t+2 / cols 32t:32t+32
    # hold the fused (2, 32) wih0 -> (xflat @ w0blk)[:, 32t:32t+32] == x_t @ wih0.
    w0blk = jnp.zeros((2 * S, G * S), jnp.float32)
    for t in range(S):
        w0blk = w0blk.at[2 * t:2 * t + 2, G * t:G * t + G].set(wih0)
    b0_tiled = jnp.tile(b0, (1, S))                                   # (1, 32S)

    # Fused layer-1 weight: [h0 | h1] @ [wih1; whh1].
    w1cat = jnp.concatenate([wih1, whh1], axis=0)                     # (16, 32)

    # Merged linearH/linearL acting on the interleaved (B, 8S) h1 layout:
    # rows 8t:8t+4 (h1_H(t)) feed cols 0:128, rows 8t+4:8t+8 (h1_L(t)) cols 128:256.
    wHt = p["linH"]["w"].T.reshape(S, HID, 2 ** 7)
    wLt = p["linL"]["w"].T.reshape(S, HID, 2 ** 7)
    whl = jnp.zeros((S, H2, XC), jnp.float32)
    whl = whl.at[:, :HID, :2 ** 7].set(wHt)
    whl = whl.at[:, HID:, 2 ** 7:].set(wLt)
    whl = whl.reshape(H2 * S, XC)                                     # (8S, 256)
    bhl = jnp.concatenate([p["linH"]["b"], p["linL"]["b"]])           # (256,)

    lr = _slab_r_layout(S)
    colsR = max(G * S, XC)
    slabR = jnp.zeros((lr["rows"], colsR), jnp.float32)
    slabR = slabR.at[lr["w0blk"]:lr["w0blk"] + 2 * S, :G * S].set(w0blk)
    slabR = slabR.at[lr["b0"], :G * S].set(b0_tiled[0])
    slabR = slabR.at[lr["whh0"]:lr["whh0"] + H2, :G].set(whh0)
    slabR = slabR.at[lr["w1cat"]:lr["w1cat"] + 2 * H2, :G].set(w1cat)
    slabR = slabR.at[lr["b1"], :G].set(b1[0])
    slabR = slabR.at[lr["whl"]:lr["whl"] + H2 * S, :XC].set(whl)
    slabR = slabR.at[lr["bhl"], :XC].set(bhl)

    emb = embedding_dim
    emb_pad = ((emb + LANE - 1) // LANE) * LANE
    ld = _slab_d_layout(S)
    slabD = jnp.zeros((ld["rows"], emb_pad), jnp.float32)
    slabD = slabD.at[ld["wp"]:ld["wp"] + 2 * S, :d2].set(p["lin_pass"]["w"].T)
    slabD = slabD.at[ld["bp"], :d2].set(p["lin_pass"]["b"])
    slabD = slabD.at[ld["w1"]:ld["w1"] + XC, :d4].set(p["lin1"]["w"].T)
    slabD = slabD.at[ld["b1"], :d4].set(p["lin1"]["b"])
    slabD = slabD.at[ld["w2"]:ld["w2"] + d4, :d2].set(p["lin2"]["w"].T)
    slabD = slabD.at[ld["b2"], :d2].set(p["lin2"]["b"])
    w3t = p["lin3"]["w"].T                                            # (80, emb)
    slabD = slabD.at[ld["w3a"]:ld["w3a"] + d2, :emb].set(w3t[:d2])
    slabD = slabD.at[ld["w3b"]:ld["w3b"] + d2, :emb].set(w3t[d2:])
    slabD = slabD.at[ld["b3"], :emb].set(p["lin3"]["b"])

    return slabR, slabD, emb_pad


# ---------------------------------------------------------------------------
# Wrapper
# ---------------------------------------------------------------------------
def encoder_forward(x, params, embedding_dim=64):
    B, S, F = x.shape
    assert F == 2, "module's reshape(B, 2*seq_len) implies n_features == 2"
    xflat = x.reshape(B, 2 * S)     # col 2t = channel 0 (Hx), col 2t+1 = channel 1 (Lx)

    slabR, slabD, emb_pad = _pack_slabs(params, S, embedding_dim)
    vmem = pl.BlockSpec(memory_space=pltpu.MemorySpace.VMEM)

    out_pad = pl.pallas_call(
        _encoder_kernel,
        out_shape=jax.ShapeDtypeStruct((B, emb_pad), jnp.float32),
        in_specs=[vmem, vmem, vmem],
        out_specs=vmem,
    )(xflat, slabR, slabD)
    return out_pad[:, :embedding_dim]


# ---------------------------------------------------------------------------
# Pure-JAX reference (same math as the PyTorch forward)
# ---------------------------------------------------------------------------
def reference_forward(x, p):
    B, S, _ = x.shape
    xflat = x.reshape(B, 2 * S)
    other = xflat @ p["lin_pass"]["w"].T + p["lin_pass"]["b"]

    def lstm2(seq, r):
        h0 = c0 = h1 = c1 = jnp.zeros((B, HID), jnp.float32)
        outs = []
        for t in range(S):
            x_t = seq[:, t:t + 1]
            g = x_t @ r["wih0"].T + r["bih0"] + h0 @ r["whh0"].T + r["bhh0"]
            i, f = jax.nn.sigmoid(g[:, :4]), jax.nn.sigmoid(g[:, 4:8])
            gg, o = jnp.tanh(g[:, 8:12]), jax.nn.sigmoid(g[:, 12:])
            c0 = f * c0 + i * gg
            h0 = o * jnp.tanh(c0)
            g1 = h0 @ r["wih1"].T + r["bih1"] + h1 @ r["whh1"].T + r["bhh1"]
            i, f = jax.nn.sigmoid(g1[:, :4]), jax.nn.sigmoid(g1[:, 4:8])
            gg, o = jnp.tanh(g1[:, 8:12]), jax.nn.sigmoid(g1[:, 12:])
            c1 = f * c1 + i * gg
            h1 = o * jnp.tanh(c1)
            outs.append(h1)
        return jnp.concatenate(outs, axis=1)  # (B, 4*S)

    Hx = jnp.tanh(lstm2(x[:, :, 0], p["rnnH"]) @ p["linH"]["w"].T + p["linH"]["b"])
    Lx = jnp.tanh(lstm2(x[:, :, 1], p["rnnL"]) @ p["linL"]["w"].T + p["linL"]["b"])
    xc = jnp.concatenate([Hx, Lx], axis=1)
    x1 = jnp.tanh(xc @ p["lin1"]["w"].T + p["lin1"]["b"])
    x2 = jnp.tanh(x1 @ p["lin2"]["w"].T + p["lin2"]["b"])
    xc2 = jnp.concatenate([x2, other], axis=1)
    return jnp.tanh(xc2 @ p["lin3"]["w"].T + p["lin3"]["b"])


if __name__ == "__main__":
    B, SEQ_LEN, N_FEATURES, EMB = 2, 8, 2, 64
    key = jax.random.PRNGKey(0)
    kx, kp = jax.random.split(key)

    x = jax.random.normal(kx, (B, SEQ_LEN, N_FEATURES), jnp.float32)
    params = make_params(kp, SEQ_LEN, EMB)

    out = encoder_forward(x, params, EMB)
    out = jax.block_until_ready(out)

    ref = reference_forward(x, params)
    assert out.shape == (B, EMB), out.shape
    assert bool(jnp.all(jnp.isfinite(out)))
    assert bool(jnp.allclose(out, ref, atol=1e-4, rtol=1e-4))
    print("KERNEL_OK")
</pallas_src>

<mosaic_0001>
module attributes {stable_mosaic.version = 11 : i64} {
  func.func @_encoder_kernel(%arg0: memref<2x16xf32, #tpu.memory_space<vmem>>, %arg1: memref<128x256xf32, #tpu.memory_space<vmem>>, %arg2: memref<464x128xf32, #tpu.memory_space<vmem>>, %arg3: memref<2x128xf32, #tpu.memory_space<vmem>>) attributes {dimension_semantics = [], scalar_prefetch = 0 : i64, scratch_operands = 0 : i64, tpu.core_type = #tpu.core_type<tc>} {
    %c0 = arith.constant 0 : index
    %c0_0 = arith.constant 0 : index
    %0 = vector.load %arg0[%c0, %c0_0] : memref<2x16xf32, #tpu.memory_space<vmem>>, vector<2x16xf32>
    %c0_1 = arith.constant 0 : index
    %c0_2 = arith.constant 0 : index
    %1 = vector.load %arg1[%c0_1, %c0_2] : memref<128x256xf32, #tpu.memory_space<vmem>>, vector<16x256xf32>
    %c16 = arith.constant 16 : index
    %c0_3 = arith.constant 0 : index
    %2 = vector.load %arg1[%c16, %c0_3] : memref<128x256xf32, #tpu.memory_space<vmem>>, vector<1x256xf32>
    %cst = arith.constant dense<0.000000e+00> : vector<2x256xf32>
    %3 = tpu.matmul %0, %1, %cst {dimension_numbers = #tpu.dot_dimension_numbers<[1], [0], [0], [1], [0, 0, 1, 1], [], []>} : vector<2x16xf32>, vector<16x256xf32>, vector<2x256xf32> -> vector<2x256xf32>
    %4 = vector.broadcast %2 : vector<1x256xf32> to vector<2x256xf32>
    %5 = arith.addf %3, %4 : vector<2x256xf32>
    %c24 = arith.constant 24 : index
    %c0_4 = arith.constant 0 : index
    %6 = vector.load %arg1[%c24, %c0_4] : memref<128x256xf32, #tpu.memory_space<vmem>>, vector<8x32xf32>
    %c32 = arith.constant 32 : index
    %c0_5 = arith.constant 0 : index
    %7 = vector.load %arg1[%c32, %c0_5] : memref<128x256xf32, #tpu.memory_space<vmem>>, vector<16x32xf32>
    %c48 = arith.constant 48 : index
    %c0_6 = arith.constant 0 : index
    %8 = vector.load %arg1[%c48, %c0_6] : memref<128x256xf32, #tpu.memory_space<vmem>>, vector<1x32xf32>
    %9 = vector.shape_cast %8 : vector<1x32xf32> to vector<1x32xf32>
    %10 = vector.broadcast %9 : vector<1x32xf32> to vector<2x32xf32>
    %c120 = arith.constant 120 : index
    %c0_7 = arith.constant 0 : index
    %11 = vector.load %arg1[%c120, %c0_7] : memref<128x256xf32, #tpu.memory_space<vmem>>, vector<1x256xf32>
    %cst_8 = arith.constant 0.000000e+00 : f32
    %12 = vector.broadcast %cst_8 : f32 to vector<2x8xf32>
    %cst_9 = arith.constant 0.000000e+00 : f32
    %13 = vector.broadcast %cst_9 : f32 to vector<2x8xf32>
    %cst_10 = arith.constant 0.000000e+00 : f32
    %14 = vector.broadcast %cst_10 : f32 to vector<2x8xf32>
    %cst_11 = arith.constant 0.000000e+00 : f32
    %15 = vector.broadcast %cst_11 : f32 to vector<2x8xf32>
    %16 = vector.shape_cast %11 : vector<1x256xf32> to vector<1x256xf32>
    %17 = vector.broadcast %16 : vector<1x256xf32> to vector<2x256xf32>
    %18 = vector.extract_strided_slice %5 {offsets = [0, 0], sizes = [2, 32], strides = [1, 1]} : vector<2x256xf32> to vector<2x32xf32>
    %cst_12 = arith.constant dense<0.000000e+00> : vector<2x32xf32>
    %19 = tpu.matmul %12, %6, %cst_12 {dimension_numbers = #tpu.dot_dimension_numbers<[1], [0], [0], [1], [0, 0, 1, 1], [], []>} : vector<2x8xf32>, vector<8x32xf32>, vector<2x32xf32> -> vector<2x32xf32>
    %20 = arith.addf %18, %19 : vector<2x32xf32>
    %21 = vector.extract_strided_slice %20 {offsets = [0, 0], sizes = [2, 8], strides = [1, 1]} : vector<2x32xf32> to vector<2x8xf32>
    %22 = arith.negf %21 : vector<2x8xf32>
    %23 = math.exp %22 : vector<2x8xf32>
    %cst_13 = arith.constant 1.000000e+00 : f32
    %24 = vector.broadcast %cst_13 : f32 to vector<2x8xf32>
    %25 = arith.addf %24, %23 : vector<2x8xf32>
    %26 = arith.divf %24, %25 : vector<2x8xf32>
    %27 = vector.extract_strided_slice %20 {offsets = [0, 8], sizes = [2, 8], strides = [1, 1]} : vector<2x32xf32> to vector<2x8xf32>
    %28 = arith.negf %27 : vector<2x8xf32>
    %29 = math.exp %28 : vector<2x8xf32>
    %cst_14 = arith.constant 1.000000e+00 : f32
    %30 = vector.broadcast %cst_14 : f32 to vector<2x8xf32>
    %31 = arith.addf %30, %29 : vector<2x8xf32>
    %32 = arith.divf %30, %31 : vector<2x8xf32>
    %33 = vector.extract_strided_slice %20 {offsets = [0, 16], sizes = [2, 8], strides = [1, 1]} : vector<2x32xf32> to vector<2x8xf32>
    %34 = math.tanh %33 : vector<2x8xf32>
    %35 = vector.extract_strided_slice %20 {offsets = [0, 24], sizes = [2, 8], strides = [1, 1]} : vector<2x32xf32> to vector<2x8xf32>
    %36 = arith.negf %35 : vector<2x8xf32>
    %37 = math.exp %36 : vector<2x8xf32>
    %cst_15 = arith.constant 1.000000e+00 : f32
    %38 = vector.broadcast %cst_15 : f32 to vector<2x8xf32>
    %39 = arith.addf %38, %37 : vector<2x8xf32>
    %40 = arith.divf %38, %39 : vector<2x8xf32>
    %41 = arith.mulf %32, %13 : vector<2x8xf32>
    %42 = arith.mulf %26, %34 : vector<2x8xf32>
    %43 = arith.addf %41, %42 : vector<2x8xf32>
    %44 = math.tanh %43 : vector<2x8xf32>
    %45 = arith.mulf %40, %44 : vector<2x8xf32>
    %46 = tpu.concatenate %45, %14 in 1 : vector<2x8xf32>, vector<2x8xf32> -> vector<2x16xf32>
    %cst_16 = arith.constant dense<0.000000e+00> : vector<2x32xf32>
    %47 = tpu.matmul %46, %7, %cst_16 {dimension_numbers = #tpu.dot_dimension_numbers<[1], [0], [0], [1], [0, 0, 1, 1], [], []>} : vector<2x16xf32>, vector<16x32xf32>, vector<2x32xf32> -> vector<2x32xf32>
    %48 = arith.addf %47, %10 : vector<2x32xf32>
    %49 = vector.extract_strided_slice %48 {offsets = [0, 0], sizes = [2, 8], strides = [1, 1]} : vector<2x32xf32> to vector<2x8xf32>
    %50 = arith.negf %49 : vector<2x8xf32>
    %51 = math.exp %50 : vector<2x8xf32>
    %cst_17 = arith.constant 1.000000e+00 : f32
    %52 = vector.broadcast %cst_17 : f32 to vector<2x8xf32>
    %53 = arith.addf %52, %51 : vector<2x8xf32>
    %54 = arith.divf %52, %53 : vector<2x8xf32>
    %55 = vector.extract_strided_slice %48 {offsets = [0, 8], sizes = [2, 8], strides = [1, 1]} : vector<2x32xf32> to vector<2x8xf32>
    %56 = arith.negf %55 : vector<2x8xf32>
    %57 = math.exp %56 : vector<2x8xf32>
    %cst_18 = arith.constant 1.000000e+00 : f32
    %58 = vector.broadcast %cst_18 : f32 to vector<2x8xf32>
    %59 = arith.addf %58, %57 : vector<2x8xf32>
    %60 = arith.divf %58, %59 : vector<2x8xf32>
    %61 = vector.extract_strided_slice %48 {offsets = [0, 16], sizes = [2, 8], strides = [1, 1]} : vector<2x32xf32> to vector<2x8xf32>
    %62 = math.tanh %61 : vector<2x8xf32>
    %63 = vector.extract_strided_slice %48 {offsets = [0, 24], sizes = [2, 8], strides = [1, 1]} : vector<2x32xf32> to vector<2x8xf32>
    %64 = arith.negf %63 : vector<2x8xf32>
    %65 = math.exp %64 : vector<2x8xf32>
    %cst_19 = arith.constant 1.000000e+00 : f32
    %66 = vector.broadcast %cst_19 : f32 to vector<2x8xf32>
    %67 = arith.addf %66, %65 : vector<2x8xf32>
    %68 = arith.divf %66, %67 : vector<2x8xf32>
    %69 = arith.mulf %60, %15 : vector<2x8xf32>
    %70 = arith.mulf %54, %62 : vector<2x8xf32>
    %71 = arith.addf %69, %70 : vector<2x8xf32>
    %72 = math.tanh %71 : vector<2x8xf32>
    %73 = arith.mulf %68, %72 : vector<2x8xf32>
    %c56 = arith.constant 56 : index
    %c0_20 = arith.constant 0 : index
    %74 = vector.load %arg1[%c56, %c0_20] : memref<128x256xf32, #tpu.memory_space<vmem>>, vector<8x256xf32>
    %cst_21 = arith.constant dense<0.000000e+00> : vector<2x256xf32>
    %75 = tpu.matmul %73, %74, %cst_21 {dimension_numbers = #tpu.dot_dimension_numbers<[1], [0], [0], [1], [0, 0, 1, 1], [], []>} : vector<2x8xf32>, vector<8x256xf32>, vector<2x256xf32> -> vector<2x256xf32>
    %76 = arith.addf %17, %75 : vector<2x256xf32>
    %77 = vector.extract_strided_slice %5 {offsets = [0, 32], sizes = [2, 32], strides = [1, 1]} : vector<2x256xf32> to vector<2x32xf32>
    %cst_22 = arith.constant dense<0.000000e+00> : vector<2x32xf32>
    %78 = tpu.matmul %45, %6, %cst_22 {dimension_numbers = #tpu.dot_dimension_numbers<[1], [0], [0], [1], [0, 0, 1, 1], [], []>} : vector<2x8xf32>, vector<8x32xf32>, vector<2x32xf32> -> vector<2x32xf32>
    %79 = arith.addf %77, %78 : vector<2x32xf32>
    %80 = vector.extract_strided_slice %79 {offsets = [0, 0], sizes = [2, 8], strides = [1, 1]} : vector<2x32xf32> to vector<2x8xf32>
    %81 = arith.negf %80 : vector<2x8xf32>
    %82 = math.exp %81 : vector<2x8xf32>
    %cst_23 = arith.constant 1.000000e+00 : f32
    %83 = vector.broadcast %cst_23 : f32 to vector<2x8xf32>
    %84 = arith.addf %83, %82 : vector<2x8xf32>
    %85 = arith.divf %83, %84 : vector<2x8xf32>
    %86 = vector.extract_strided_slice %79 {offsets = [0, 8], sizes = [2, 8], strides = [1, 1]} : vector<2x32xf32> to vector<2x8xf32>
    %87 = arith.negf %86 : vector<2x8xf32>
    %88 = math.exp %87 : vector<2x8xf32>
    %cst_24 = arith.constant 1.000000e+00 : f32
    %89 = vector.broadcast %cst_24 : f32 to vector<2x8xf32>
    %90 = arith.addf %89, %88 : vector<2x8xf32>
    %91 = arith.divf %89, %90 : vector<2x8xf32>
    %92 = vector.extract_strided_slice %79 {offsets = [0, 16], sizes = [2, 8], strides = [1, 1]} : vector<2x32xf32> to vector<2x8xf32>
    %93 = math.tanh %92 : vector<2x8xf32>
    %94 = vector.extract_strided_slice %79 {offsets = [0, 24], sizes = [2, 8], strides = [1, 1]} : vector<2x32xf32> to vector<2x8xf32>
    %95 = arith.negf %94 : vector<2x8xf32>
    %96 = math.exp %95 : vector<2x8xf32>
    %cst_25 = arith.constant 1.000000e+00 : f32
    %97 = vector.broadcast %cst_25 : f32 to vector<2x8xf32>
    %98 = arith.addf %97, %96 : vector<2x8xf32>
    %99 = arith.divf %97, %98 : vector<2x8xf32>
    %100 = arith.mulf %91, %43 : vector<2x8xf32>
    %101 = arith.mulf %85, %93 : vector<2x8xf32>
    %102 = arith.addf %100, %101 : vector<2x8xf32>
    %103 = math.tanh %102 : vector<2x8xf32>
    %104 = arith.mulf %99, %103 : vector<2x8xf32>
    %105 = tpu.concatenate %104, %73 in 1 : vector<2x8xf32>, vector<2x8xf32> -> vector<2x16xf32>
    %cst_26 = arith.constant dense<0.000000e+00> : vector<2x32xf32>
    %106 = tpu.matmul %105, %7, %cst_26 {dimension_numbers = #tpu.dot_dimension_numbers<[1], [0], [0], [1], [0, 0, 1, 1], [], []>} : vector<2x16xf32>, vector<16x32xf32>, vector<2x32xf32> -> vector<2x32xf32>
    %107 = arith.addf %106, %10 : vector<2x32xf32>
    %108 = vector.extract_strided_slice %107 {offsets = [0, 0], sizes = [2, 8], strides = [1, 1]} : vector<2x32xf32> to vector<2x8xf32>
    %109 = arith.negf %108 : vector<2x8xf32>
    %110 = math.exp %109 : vector<2x8xf32>
    %cst_27 = arith.constant 1.000000e+00 : f32
    %111 = vector.broadcast %cst_27 : f32 to vector<2x8xf32>
    %112 = arith.addf %111, %110 : vector<2x8xf32>
    %113 = arith.divf %111, %112 : vector<2x8xf32>
    %114 = vector.extract_strided_slice %107 {offsets = [0, 8], sizes = [2, 8], strides = [1, 1]} : vector<2x32xf32> to vector<2x8xf32>
    %115 = arith.negf %114 : vector<2x8xf32>
    %116 = math.exp %115 : vector<2x8xf32>
    %cst_28 = arith.constant 1.000000e+00 : f32
    %117 = vector.broadcast %cst_28 : f32 to vector<2x8xf32>
    %118 = arith.addf %117, %116 : vector<2x8xf32>
    %119 = arith.divf %117, %118 : vector<2x8xf32>
    %120 = vector.extract_strided_slice %107 {offsets = [0, 16], sizes = [2, 8], strides = [1, 1]} : vector<2x32xf32> to vector<2x8xf32>
    %121 = math.tanh %120 : vector<2x8xf32>
    %122 = vector.extract_strided_slice %107 {offsets = [0, 24], sizes = [2, 8], strides = [1, 1]} : vector<2x32xf32> to vector<2x8xf32>
    %123 = arith.negf %122 : vector<2x8xf32>
    %124 = math.exp %123 : vector<2x8xf32>
    %cst_29 = arith.constant 1.000000e+00 : f32
    %125 = vector.broadcast %cst_29 : f32 to vector<2x8xf32>
    %126 = arith.addf %125, %124 : vector<2x8xf32>
    %127 = arith.divf %125, %126 : vector<2x8xf32>
    %128 = arith.mulf %119, %71 : vector<2x8xf32>
    %129 = arith.mulf %113, %121 : vector<2x8xf32>
    %130 = arith.addf %128, %129 : vector<2x8xf32>
    %131 = math.tanh %130 : vector<2x8xf32>
    %132 = arith.mulf %127, %131 : vector<2x8xf32>
    %c64 = arith.constant 64 : index
    %c0_30 = arith.constant 0 : index
    %133 = vector.load %arg1[%c64, %c0_30] : memref<128x256xf32, #tpu.memory_space<vmem>>, vector<8x256xf32>
    %cst_31 = arith.constant dense<0.000000e+00> : vector<2x256xf32>
    %134 = tpu.matmul %132, %133, %cst_31 {dimension_numbers = #tpu.dot_dimension_numbers<[1], [0], [0], [1], [0, 0, 1, 1], [], []>} : vector<2x8xf32>, vector<8x256xf32>, vector<2x256xf32> -> vector<2x256xf32>
    %135 = arith.addf %76, %134 : vector<2x256xf32>
    %136 = vector.extract_strided_slice %5 {offsets = [0, 64], sizes = [2, 32], strides = [1, 1]} : vector<2x256xf32> to vector<2x32xf32>
    %cst_32 = arith.constant dense<0.000000e+00> : vector<2x32xf32>
    %137 = tpu.matmul %104, %6, %cst_32 {dimension_numbers = #tpu.dot_dimension_numbers<[1], [0], [0], [1], [0, 0, 1, 1], [], []>} : vector<2x8xf32>, vector<8x32xf32>, vector<2x32xf32> -> vector<2x32xf32>
    %138 = arith.addf %136, %137 : vector<2x32xf32>
    %139 = vector.extract_strided_slice %138 {offsets = [0, 0], sizes = [2, 8], strides = [1, 1]} : vector<2x32xf32> to vector<2x8xf32>
    %140 = arith.negf %139 : vector<2x8xf32>
    %141 = math.exp %140 : vector<2x8xf32>
    %cst_33 = arith.constant 1.000000e+00 : f32
    %142 = vector.broadcast %cst_33 : f32 to vector<2x8xf32>
    %143 = arith.addf %142, %141 : vector<2x8xf32>
    %144 = arith.divf %142, %143 : vector<2x8xf32>
    %145 = vector.extract_strided_slice %138 {offsets = [0, 8], sizes = [2, 8], strides = [1, 1]} : vector<2x32xf32> to vector<2x8xf32>
    %146 = arith.negf %145 : vector<2x8xf32>
    %147 = math.exp %146 : vector<2x8xf32>
    %cst_34 = arith.constant 1.000000e+00 : f32
    %148 = vector.broadcast %cst_34 : f32 to vector<2x8xf32>
    %149 = arith.addf %148, %147 : vector<2x8xf32>
    %150 = arith.divf %148, %149 : vector<2x8xf32>
    %151 = vector.extract_strided_slice %138 {offsets = [0, 16], sizes = [2, 8], strides = [1, 1]} : vector<2x32xf32> to vector<2x8xf32>
    %152 = math.tanh %151 : vector<2x8xf32>
    %153 = vector.extract_strided_slice %138 {offsets = [0, 24], sizes = [2, 8], strides = [1, 1]} : vector<2x32xf32> to vector<2x8xf32>
    %154 = arith.negf %153 : vector<2x8xf32>
    %155 = math.exp %154 : vector<2x8xf32>
    %cst_35 = arith.constant 1.000000e+00 : f32
    %156 = vector.broadcast %cst_35 : f32 to vector<2x8xf32>
    %157 = arith.addf %156, %155 : vector<2x8xf32>
    %158 = arith.divf %156, %157 : vector<2x8xf32>
    %159 = arith.mulf %150, %102 : vector<2x8xf32>
    %160 = arith.mulf %144, %152 : vector<2x8xf32>
    %161 = arith.addf %159, %160 : vector<2x8xf32>
    %162 = math.tanh %161 : vector<2x8xf32>
    %163 = arith.mulf %158, %162 : vector<2x8xf32>
    %164 = tpu.concatenate %163, %132 in 1 : vector<2x8xf32>, vector<2x8xf32> -> vector<2x16xf32>
    %cst_36 = arith.constant dense<0.000000e+00> : vector<2x32xf32>
    %165 = tpu.matmul %164, %7, %cst_36 {dimension_numbers = #tpu.dot_dimension_numbers<[1], [0], [0], [1], [0, 0, 1, 1], [], []>} : vector<2x16xf32>, vector<16x32xf32>, vector<2x32xf32> -> vector<2x32xf32>
    %166 = arith.addf %165, %10 : vector<2x32xf32>
    %167 = vector.extract_strided_slice %166 {offsets = [0, 0], sizes = [2, 8], strides = [1, 1]} : vector<2x32xf32> to vector<2x8xf32>
    %168 = arith.negf %167 : vector<2x8xf32>
    %169 = math.exp %168 : vector<2x8xf32>
    %cst_37 = arith.constant 1.000000e+00 : f32
    %170 = vector.broadcast %cst_37 : f32 to vector<2x8xf32>
    %171 = arith.addf %170, %169 : vector<2x8xf32>
    %172 = arith.divf %170, %171 : vector<2x8xf32>
    %173 = vector.extract_strided_slice %166 {offsets = [0, 8], sizes = [2, 8], strides = [1, 1]} : vector<2x32xf32> to vector<2x8xf32>
    %174 = arith.negf %173 : vector<2x8xf32>
    %175 = math.exp %174 : vector<2x8xf32>
    %cst_38 = arith.constant 1.000000e+00 : f32
    %176 = vector.broadcast %cst_38 : f32 to vector<2x8xf32>
    %177 = arith.addf %176, %175 : vector<2x8xf32>
    %178 = arith.divf %176, %177 : vector<2x8xf32>
    %179 = vector.extract_strided_slice %166 {offsets = [0, 16], sizes = [2, 8], strides = [1, 1]} : vector<2x32xf32> to vector<2x8xf32>
    %180 = math.tanh %179 : vector<2x8xf32>
    %181 = vector.extract_strided_slice %166 {offsets = [0, 24], sizes = [2, 8], strides = [1, 1]} : vector<2x32xf32> to vector<2x8xf32>
    %182 = arith.negf %181 : vector<2x8xf32>
    %183 = math.exp %182 : vector<2x8xf32>
    %cst_39 = arith.constant 1.000000e+00 : f32
    %184 = vector.broadcast %cst_39 : f32 to vector<2x8xf32>
    %185 = arith.addf %184, %183 : vector<2x8xf32>
    %186 = arith.divf %184, %185 : vector<2x8xf32>
    %187 = arith.mulf %178, %130 : vector<2x8xf32>
    %188 = arith.mulf %172, %180 : vector<2x8xf32>
    %189 = arith.addf %187, %188 : vector<2x8xf32>
    %190 = math.tanh %189 : vector<2x8xf32>
    %191 = arith.mulf %186, %190 : vector<2x8xf32>
    %c72 = arith.constant 72 : index
    %c0_40 = arith.constant 0 : index
    %192 = vector.load %arg1[%c72, %c0_40] : memref<128x256xf32, #tpu.memory_space<vmem>>, vector<8x256xf32>
    %cst_41 = arith.constant dense<0.000000e+00> : vector<2x256xf32>
    %193 = tpu.matmul %191, %192, %cst_41 {dimension_numbers = #tpu.dot_dimension_numbers<[1], [0], [0], [1], [0, 0, 1, 1], [], []>} : vector<2x8xf32>, vector<8x256xf32>, vector<2x256xf32> -> vector<2x256xf32>
    %194 = arith.addf %135, %193 : vector<2x256xf32>
    %195 = vector.extract_strided_slice %5 {offsets = [0, 96], sizes = [2, 32], strides = [1, 1]} : vector<2x256xf32> to vector<2x32xf32>
    %cst_42 = arith.constant dense<0.000000e+00> : vector<2x32xf32>
    %196 = tpu.matmul %163, %6, %cst_42 {dimension_numbers = #tpu.dot_dimension_numbers<[1], [0], [0], [1], [0, 0, 1, 1], [], []>} : vector<2x8xf32>, vector<8x32xf32>, vector<2x32xf32> -> vector<2x32xf32>
    %197 = arith.addf %195, %196 : vector<2x32xf32>
    %198 = vector.extract_strided_slice %197 {offsets = [0, 0], sizes = [2, 8], strides = [1, 1]} : vector<2x32xf32> to vector<2x8xf32>
    %199 = arith.negf %198 : vector<2x8xf32>
    %200 = math.exp %199 : vector<2x8xf32>
    %cst_43 = arith.constant 1.000000e+00 : f32
    %201 = vector.broadcast %cst_43 : f32 to vector<2x8xf32>
    %202 = arith.addf %201, %200 : vector<2x8xf32>
    %203 = arith.divf %201, %202 : vector<2x8xf32>
    %204 = vector.extract_strided_slice %197 {offsets = [0, 8], sizes = [2, 8], strides = [1, 1]} : vector<2x32xf32> to vector<2x8xf32>
    %205 = arith.negf %204 : vector<2x8xf32>
    %206 = math.exp %205 : vector<2x8xf32>
    %cst_44 = arith.constant 1.000000e+00 : f32
    %207 = vector.broadcast %cst_44 : f32 to vector<2x8xf32>
    %208 = arith.addf %207, %206 : vector<2x8xf32>
    %209 = arith.divf %207, %208 : vector<2x8xf32>
    %210 = vector.extract_strided_slice %197 {offsets = [0, 16], sizes = [2, 8], strides = [1, 1]} : vector<2x32xf32> to vector<2x8xf32>
    %211 = math.tanh %210 : vector<2x8xf32>
    %212 = vector.extract_strided_slice %197 {offsets = [0, 24], sizes = [2, 8], strides = [1, 1]} : vector<2x32xf32> to vector<2x8xf32>
    %213 = arith.negf %212 : vector<2x8xf32>
    %214 = math.exp %213 : vector<2x8xf32>
    %cst_45 = arith.constant 1.000000e+00 : f32
    %215 = vector.broadcast %cst_45 : f32 to vector<2x8xf32>
    %216 = arith.addf %215, %214 : vector<2x8xf32>
    %217 = arith.divf %215, %216 : vector<2x8xf32>
    %218 = arith.mulf %209, %161 : vector<2x8xf32>
    %219 = arith.mulf %203, %211 : vector<2x8xf32>
    %220 = arith.addf %218, %219 : vector<2x8xf32>
    %221 = math.tanh %220 : vector<2x8xf32>
    %222 = arith.mulf %217, %221 : vector<2x8xf32>
    %223 = tpu.concatenate %222, %191 in 1 : vector<2x8xf32>, vector<2x8xf32> -> vector<2x16xf32>
    %cst_46 = arith.constant dense<0.000000e+00> : vector<2x32xf32>
    %224 = tpu.matmul %223, %7, %cst_46 {dimension_numbers = #tpu.dot_dimension_numbers<[1], [0], [0], [1], [0, 0, 1, 1], [], []>} : vector<2x16xf32>, vector<16x32xf32>, vector<2x32xf32> -> vector<2x32xf32>
    %225 = arith.addf %224, %10 : vector<2x32xf32>
    %226 = vector.extract_strided_slice %225 {offsets = [0, 0], sizes = [2, 8], strides = [1, 1]} : vector<2x32xf32> to vector<2x8xf32>
    %227 = arith.negf %226 : vector<2x8xf32>
    %228 = math.exp %227 : vector<2x8xf32>
    %cst_47 = arith.constant 1.000000e+00 : f32
    %229 = vector.broadcast %cst_47 : f32 to vector<2x8xf32>
    %230 = arith.addf %229, %228 : vector<2x8xf32>
    %231 = arith.divf %229, %230 : vector<2x8xf32>
    %232 = vector.extract_strided_slice %225 {offsets = [0, 8], sizes = [2, 8], strides = [1, 1]} : vector<2x32xf32> to vector<2x8xf32>
    %233 = arith.negf %232 : vector<2x8xf32>
    %234 = math.exp %233 : vector<2x8xf32>
    %cst_48 = arith.constant 1.000000e+00 : f32
    %235 = vector.broadcast %cst_48 : f32 to vector<2x8xf32>
    %236 = arith.addf %235, %234 : vector<2x8xf32>
    %237 = arith.divf %235, %236 : vector<2x8xf32>
    %238 = vector.extract_strided_slice %225 {offsets = [0, 16], sizes = [2, 8], strides = [1, 1]} : vector<2x32xf32> to vector<2x8xf32>
    %239 = math.tanh %238 : vector<2x8xf32>
    %240 = vector.extract_strided_slice %225 {offsets = [0, 24], sizes = [2, 8], strides = [1, 1]} : vector<2x32xf32> to vector<2x8xf32>
    %241 = arith.negf %240 : vector<2x8xf32>
    %242 = math.exp %241 : vector<2x8xf32>
    %cst_49 = arith.constant 1.000000e+00 : f32
    %243 = vector.broadcast %cst_49 : f32 to vector<2x8xf32>
    %244 = arith.addf %243, %242 : vector<2x8xf32>
    %245 = arith.divf %243, %244 : vector<2x8xf32>
    %246 = arith.mulf %237, %189 : vector<2x8xf32>
    %247 = arith.mulf %231, %239 : vector<2x8xf32>
    %248 = arith.addf %246, %247 : vector<2x8xf32>
    %249 = math.tanh %248 : vector<2x8xf32>
    %250 = arith.mulf %245, %249 : vector<2x8xf32>
    %c80 = arith.constant 80 : index
    %c0_50 = arith.constant 0 : index
    %251 = vector.load %arg1[%c80, %c0_50] : memref<128x256xf32, #tpu.memory_space<vmem>>, vector<8x256xf32>
    %cst_51 = arith.constant dense<0.000000e+00> : vector<2x256xf32>
    %252 = tpu.matmul %250, %251, %cst_51 {dimension_numbers = #tpu.dot_dimension_numbers<[1], [0], [0], [1], [0, 0, 1, 1], [], []>} : vector<2x8xf32>, vector<8x256xf32>, vector<2x256xf32> -> vector<2x256xf32>
    %253 = arith.addf %194, %252 : vector<2x256xf32>
    %254 = vector.extract_strided_slice %5 {offsets = [0, 128], sizes = [2, 32], strides = [1, 1]} : vector<2x256xf32> to vector<2x32xf32>
    %cst_52 = arith.constant dense<0.000000e+00> : vector<2x32xf32>
    %255 = tpu.matmul %222, %6, %cst_52 {dimension_numbers = #tpu.dot_dimension_numbers<[1], [0], [0], [1], [0, 0, 1, 1], [], []>} : vector<2x8xf32>, vector<8x32xf32>, vector<2x32xf32> -> vector<2x32xf32>
    %256 = arith.addf %254, %255 : vector<2x32xf32>
    %257 = vector.extract_strided_slice %256 {offsets = [0, 0], sizes = [2, 8], strides = [1, 1]} : vector<2x32xf32> to vector<2x8xf32>
    %258 = arith.negf %257 : vector<2x8xf32>
    %259 = math.exp %258 : vector<2x8xf32>
    %cst_53 = arith.constant 1.000000e+00 : f32
    %260 = vector.broadcast %cst_53 : f32 to vector<2x8xf32>
    %261 = arith.addf %260, %259 : vector<2x8xf32>
    %262 = arith.divf %260, %261 : vector<2x8xf32>
    %263 = vector.extract_strided_slice %256 {offsets = [0, 8], sizes = [2, 8], strides = [1, 1]} : vector<2x32xf32> to vector<2x8xf32>
    %264 = arith.negf %263 : vector<2x8xf32>
    %265 = math.exp %264 : vector<2x8xf32>
    %cst_54 = arith.constant 1.000000e+00 : f32
    %266 = vector.broadcast %cst_54 : f32 to vector<2x8xf32>
    %267 = arith.addf %266, %265 : vector<2x8xf32>
    %268 = arith.divf %266, %267 : vector<2x8xf32>
    %269 = vector.extract_strided_slice %256 {offsets = [0, 16], sizes = [2, 8], strides = [1, 1]} : vector<2x32xf32> to vector<2x8xf32>
    %270 = math.tanh %269 : vector<2x8xf32>
    %271 = vector.extract_strided_slice %256 {offsets = [0, 24], sizes = [2, 8], strides = [1, 1]} : vector<2x32xf32> to vector<2x8xf32>
    %272 = arith.negf %271 : vector<2x8xf32>
    %273 = math.exp %272 : vector<2x8xf32>
    %cst_55 = arith.constant 1.000000e+00 : f32
    %274 = vector.broadcast %cst_55 : f32 to vector<2x8xf32>
    %275 = arith.addf %274, %273 : vector<2x8xf32>
    %276 = arith.divf %274, %275 : vector<2x8xf32>
    %277 = arith.mulf %268, %220 : vector<2x8xf32>
    %278 = arith.mulf %262, %270 : vector<2x8xf32>
    %279 = arith.addf %277, %278 : vector<2x8xf32>
    %280 = math.tanh %279 : vector<2x8xf32>
    %281 = arith.mulf %276, %280 : vector<2x8xf32>
    %282 = tpu.concatenate %281, %250 in 1 : vector<2x8xf32>, vector<2x8xf32> -> vector<2x16xf32>
    %cst_56 = arith.constant dense<0.000000e+00> : vector<2x32xf32>
    %283 = tpu.matmul %282, %7, %cst_56 {dimension_numbers = #tpu.dot_dimension_numbers<[1], [0], [0], [1], [0, 0, 1, 1], [], []>} : vector<2x16xf32>, vector<16x32xf32>, vector<2x32xf32> -> vector<2x32xf32>
    %284 = arith.addf %283, %10 : vector<2x32xf32>
    %285 = vector.extract_strided_slice %284 {offsets = [0, 0], sizes = [2, 8], strides = [1, 1]} : vector<2x32xf32> to vector<2x8xf32>
    %286 = arith.negf %285 : vector<2x8xf32>
    %287 = math.exp %286 : vector<2x8xf32>
    %cst_57 = arith.constant 1.000000e+00 : f32
    %288 = vector.broadcast %cst_57 : f32 to vector<2x8xf32>
    %289 = arith.addf %288, %287 : vector<2x8xf32>
    %290 = arith.divf %288, %289 : vector<2x8xf32>
    %291 = vector.extract_strided_slice %284 {offsets = [0, 8], sizes = [2, 8], strides = [1, 1]} : vector<2x32xf32> to vector<2x8xf32>
    %292 = arith.negf %291 : vector<2x8xf32>
    %293 = math.exp %292 : vector<2x8xf32>
    %cst_58 = arith.constant 1.000000e+00 : f32
    %294 = vector.broadcast %cst_58 : f32 to vector<2x8xf32>
    %295 = arith.addf %294, %293 : vector<2x8xf32>
    %296 = arith.divf %294, %295 : vector<2x8xf32>
    %297 = vector.extract_strided_slice %284 {offsets = [0, 16], sizes = [2, 8], strides = [1, 1]} : vector<2x32xf32> to vector<2x8xf32>
    %298 = math.tanh %297 : vector<2x8xf32>
    %299 = vector.extract_strided_slice %284 {offsets = [0, 24], sizes = [2, 8], strides = [1, 1]} : vector<2x32xf32> to vector<2x8xf32>
    %300 = arith.negf %299 : vector<2x8xf32>
    %301 = math.exp %300 : vector<2x8xf32>
    %cst_59 = arith.constant 1.000000e+00 : f32
    %302 = vector.broadcast %cst_59 : f32 to vector<2x8xf32>
    %303 = arith.addf %302, %301 : vector<2x8xf32>
    %304 = arith.divf %302, %303 : vector<2x8xf32>
    %305 = arith.mulf %296, %248 : vector<2x8xf32>
    %306 = arith.mulf %290, %298 : vector<2x8xf32>
    %307 = arith.addf %305, %306 : vector<2x8xf32>
    %308 = math.tanh %307 : vector<2x8xf32>
    %309 = arith.mulf %304, %308 : vector<2x8xf32>
    %c88 = arith.constant 88 : index
    %c0_60 = arith.constant 0 : index
    %310 = vector.load %arg1[%c88, %c0_60] : memref<128x256xf32, #tpu.memory_space<vmem>>, vector<8x256xf32>
    %cst_61 = arith.constant dense<0.000000e+00> : vector<2x256xf32>
    %311 = tpu.matmul %309, %310, %cst_61 {dimension_numbers = #tpu.dot_dimension_numbers<[1], [0], [0], [1], [0, 0, 1, 1], [], []>} : vector<2x8xf32>, vector<8x256xf32>, vector<2x256xf32> -> vector<2x256xf32>
    %312 = arith.addf %253, %311 : vector<2x256xf32>
    %313 = vector.extract_strided_slice %5 {offsets = [0, 160], sizes = [2, 32], strides = [1, 1]} : vector<2x256xf32> to vector<2x32xf32>
    %cst_62 = arith.constant dense<0.000000e+00> : vector<2x32xf32>
    %314 = tpu.matmul %281, %6, %cst_62 {dimension_numbers = #tpu.dot_dimension_numbers<[1], [0], [0], [1], [0, 0, 1, 1], [], []>} : vector<2x8xf32>, vector<8x32xf32>, vector<2x32xf32> -> vector<2x32xf32>
    %315 = arith.addf %313, %314 : vector<2x32xf32>
    %316 = vector.extract_strided_slice %315 {offsets = [0, 0], sizes = [2, 8], strides = [1, 1]} : vector<2x32xf32> to vector<2x8xf32>
    %317 = arith.negf %316 : vector<2x8xf32>
    %318 = math.exp %317 : vector<2x8xf32>
    %cst_63 = arith.constant 1.000000e+00 : f32
    %319 = vector.broadcast %cst_63 : f32 to vector<2x8xf32>
    %320 = arith.addf %319, %318 : vector<2x8xf32>
    %321 = arith.divf %319, %320 : vector<2x8xf32>
    %322 = vector.extract_strided_slice %315 {offsets = [0, 8], sizes = [2, 8], strides = [1, 1]} : vector<2x32xf32> to vector<2x8xf32>
    %323 = arith.negf %322 : vector<2x8xf32>
    %324 = math.exp %323 : vector<2x8xf32>
    %cst_64 = arith.constant 1.000000e+00 : f32
    %325 = vector.broadcast %cst_64 : f32 to vector<2x8xf32>
    %326 = arith.addf %325, %324 : vector<2x8xf32>
    %327 = arith.divf %325, %326 : vector<2x8xf32>
    %328 = vector.extract_strided_slice %315 {offsets = [0, 16], sizes = [2, 8], strides = [1, 1]} : vector<2x32xf32> to vector<2x8xf32>
    %329 = math.tanh %328 : vector<2x8xf32>
    %330 = vector.extract_strided_slice %315 {offsets = [0, 24], sizes = [2, 8], strides = [1, 1]} : vector<2x32xf32> to vector<2x8xf32>
    %331 = arith.negf %330 : vector<2x8xf32>
    %332 = math.exp %331 : vector<2x8xf32>
    %cst_65 = arith.constant 1.000000e+00 : f32
    %333 = vector.broadcast %cst_65 : f32 to vector<2x8xf32>
    %334 = arith.addf %333, %332 : vector<2x8xf32>
    %335 = arith.divf %333, %334 : vector<2x8xf32>
    %336 = arith.mulf %327, %279 : vector<2x8xf32>
    %337 = arith.mulf %321, %329 : vector<2x8xf32>
    %338 = arith.addf %336, %337 : vector<2x8xf32>
    %339 = math.tanh %338 : vector<2x8xf32>
    %340 = arith.mulf %335, %339 : vector<2x8xf32>
    %341 = tpu.concatenate %340, %309 in 1 : vector<2x8xf32>, vector<2x8xf32> -> vector<2x16xf32>
    %cst_66 = arith.constant dense<0.000000e+00> : vector<2x32xf32>
    %342 = tpu.matmul %341, %7, %cst_66 {dimension_numbers = #tpu.dot_dimension_numbers<[1], [0], [0], [1], [0, 0, 1, 1], [], []>} : vector<2x16xf32>, vector<16x32xf32>, vector<2x32xf32> -> vector<2x32xf32>
    %343 = arith.addf %342, %10 : vector<2x32xf32>
    %344 = vector.extract_strided_slice %343 {offsets = [0, 0], sizes = [2, 8], strides = [1, 1]} : vector<2x32xf32> to vector<2x8xf32>
    %345 = arith.negf %344 : vector<2x8xf32>
    %346 = math.exp %345 : vector<2x8xf32>
    %cst_67 = arith.constant 1.000000e+00 : f32
    %347 = vector.broadcast %cst_67 : f32 to vector<2x8xf32>
    %348 = arith.addf %347, %346 : vector<2x8xf32>
    %349 = arith.divf %347, %348 : vector<2x8xf32>
    %350 = vector.extract_strided_slice %343 {offsets = [0, 8], sizes = [2, 8], strides = [1, 1]} : vector<2x32xf32> to vector<2x8xf32>
    %351 = arith.negf %350 : vector<2x8xf32>
    %352 = math.exp %351 : vector<2x8xf32>
    %cst_68 = arith.constant 1.000000e+00 : f32
    %353 = vector.broadcast %cst_68 : f32 to vector<2x8xf32>
    %354 = arith.addf %353, %352 : vector<2x8xf32>
    %355 = arith.divf %353, %354 : vector<2x8xf32>
    %356 = vector.extract_strided_slice %343 {offsets = [0, 16], sizes = [2, 8], strides = [1, 1]} : vector<2x32xf32> to vector<2x8xf32>
    %357 = math.tanh %356 : vector<2x8xf32>
    %358 = vector.extract_strided_slice %343 {offsets = [0, 24], sizes = [2, 8], strides = [1, 1]} : vector<2x32xf32> to vector<2x8xf32>
    %359 = arith.negf %358 : vector<2x8xf32>
    %360 = math.exp %359 : vector<2x8xf32>
    %cst_69 = arith.constant 1.000000e+00 : f32
    %361 = vector.broadcast %cst_69 : f32 to vector<2x8xf32>
    %362 = arith.addf %361, %360 : vector<2x8xf32>
    %363 = arith.divf %361, %362 : vector<2x8xf32>
    %364 = arith.mulf %355, %307 : vector<2x8xf32>
    %365 = arith.mulf %349, %357 : vector<2x8xf32>
    %366 = arith.addf %364, %365 : vector<2x8xf32>
    %367 = math.tanh %366 : vector<2x8xf32>
    %368 = arith.mulf %363, %367 : vector<2x8xf32>
    %c96 = arith.constant 96 : index
    %c0_70 = arith.constant 0 : index
    %369 = vector.load %arg1[%c96, %c0_70] : memref<128x256xf32, #tpu.memory_space<vmem>>, vector<8x256xf32>
    %cst_71 = arith.constant dense<0.000000e+00> : vector<2x256xf32>
    %370 = tpu.matmul %368, %369, %cst_71 {dimension_numbers = #tpu.dot_dimension_numbers<[1], [0], [0], [1], [0, 0, 1, 1], [], []>} : vector<2x8xf32>, vector<8x256xf32>, vector<2x256xf32> -> vector<2x256xf32>
    %371 = arith.addf %312, %370 : vector<2x256xf32>
    %372 = vector.extract_strided_slice %5 {offsets = [0, 192], sizes = [2, 32], strides = [1, 1]} : vector<2x256xf32> to vector<2x32xf32>
    %cst_72 = arith.constant dense<0.000000e+00> : vector<2x32xf32>
    %373 = tpu.matmul %340, %6, %cst_72 {dimension_numbers = #tpu.dot_dimension_numbers<[1], [0], [0], [1], [0, 0, 1, 1], [], []>} : vector<2x8xf32>, vector<8x32xf32>, vector<2x32xf32> -> vector<2x32xf32>
    %374 = arith.addf %372, %373 : vector<2x32xf32>
    %375 = vector.extract_strided_slice %374 {offsets = [0, 0], sizes = [2, 8], strides = [1, 1]} : vector<2x32xf32> to vector<2x8xf32>
    %376 = arith.negf %375 : vector<2x8xf32>
    %377 = math.exp %376 : vector<2x8xf32>
    %cst_73 = arith.constant 1.000000e+00 : f32
    %378 = vector.broadcast %cst_73 : f32 to vector<2x8xf32>
    %379 = arith.addf %378, %377 : vector<2x8xf32>
    %380 = arith.divf %378, %379 : vector<2x8xf32>
    %381 = vector.extract_strided_slice %374 {offsets = [0, 8], sizes = [2, 8], strides = [1, 1]} : vector<2x32xf32> to vector<2x8xf32>
    %382 = arith.negf %381 : vector<2x8xf32>
    %383 = math.exp %382 : vector<2x8xf32>
    %cst_74 = arith.constant 1.000000e+00 : f32
    %384 = vector.broadcast %cst_74 : f32 to vector<2x8xf32>
    %385 = arith.addf %384, %383 : vector<2x8xf32>
    %386 = arith.divf %384, %385 : vector<2x8xf32>
    %387 = vector.extract_strided_slice %374 {offsets = [0, 16], sizes = [2, 8], strides = [1, 1]} : vector<2x32xf32> to vector<2x8xf32>
    %388 = math.tanh %387 : vector<2x8xf32>
    %389 = vector.extract_strided_slice %374 {offsets = [0, 24], sizes = [2, 8], strides = [1, 1]} : vector<2x32xf32> to vector<2x8xf32>
    %390 = arith.negf %389 : vector<2x8xf32>
    %391 = math.exp %390 : vector<2x8xf32>
    %cst_75 = arith.constant 1.000000e+00 : f32
    %392 = vector.broadcast %cst_75 : f32 to vector<2x8xf32>
    %393 = arith.addf %392, %391 : vector<2x8xf32>
    %394 = arith.divf %392, %393 : vector<2x8xf32>
    %395 = arith.mulf %386, %338 : vector<2x8xf32>
    %396 = arith.mulf %380, %388 : vector<2x8xf32>
    %397 = arith.addf %395, %396 : vector<2x8xf32>
    %398 = math.tanh %397 : vector<2x8xf32>
    %399 = arith.mulf %394, %398 : vector<2x8xf32>
    %400 = tpu.concatenate %399, %368 in 1 : vector<2x8xf32>, vector<2x8xf32> -> vector<2x16xf32>
    %cst_76 = arith.constant dense<0.000000e+00> : vector<2x32xf32>
    %401 = tpu.matmul %400, %7, %cst_76 {dimension_numbers = #tpu.dot_dimension_numbers<[1], [0], [0], [1], [0, 0, 1, 1], [], []>} : vector<2x16xf32>, vector<16x32xf32>, vector<2x32xf32> -> vector<2x32xf32>
    %402 = arith.addf %401, %10 : vector<2x32xf32>
    %403 = vector.extract_strided_slice %402 {offsets = [0, 0], sizes = [2, 8], strides = [1, 1]} : vector<2x32xf32> to vector<2x8xf32>
    %404 = arith.negf %403 : vector<2x8xf32>
    %405 = math.exp %404 : vector<2x8xf32>
    %cst_77 = arith.constant 1.000000e+00 : f32
    %406 = vector.broadcast %cst_77 : f32 to vector<2x8xf32>
    %407 = arith.addf %406, %405 : vector<2x8xf32>
    %408 = arith.divf %406, %407 : vector<2x8xf32>
    %409 = vector.extract_strided_slice %402 {offsets = [0, 8], sizes = [2, 8], strides = [1, 1]} : vector<2x32xf32> to vector<2x8xf32>
    %410 = arith.negf %409 : vector<2x8xf32>
    %411 = math.exp %410 : vector<2x8xf32>
    %cst_78 = arith.constant 1.000000e+00 : f32
    %412 = vector.broadcast %cst_78 : f32 to vector<2x8xf32>
    %413 = arith.addf %412, %411 : vector<2x8xf32>
    %414 = arith.divf %412, %413 : vector<2x8xf32>
    %415 = vector.extract_strided_slice %402 {offsets = [0, 16], sizes = [2, 8], strides = [1, 1]} : vector<2x32xf32> to vector<2x8xf32>
    %416 = math.tanh %415 : vector<2x8xf32>
    %417 = vector.extract_strided_slice %402 {offsets = [0, 24], sizes = [2, 8], strides = [1, 1]} : vector<2x32xf32> to vector<2x8xf32>
    %418 = arith.negf %417 : vector<2x8xf32>
    %419 = math.exp %418 : vector<2x8xf32>
    %cst_79 = arith.constant 1.000000e+00 : f32
    %420 = vector.broadcast %cst_79 : f32 to vector<2x8xf32>
    %421 = arith.addf %420, %419 : vector<2x8xf32>
    %422 = arith.divf %420, %421 : vector<2x8xf32>
    %423 = arith.mulf %414, %366 : vector<2x8xf32>
    %424 = arith.mulf %408, %416 : vector<2x8xf32>
    %425 = arith.addf %423, %424 : vector<2x8xf32>
    %426 = math.tanh %425 : vector<2x8xf32>
    %427 = arith.mulf %422, %426 : vector<2x8xf32>
    %c104 = arith.constant 104 : index
    %c0_80 = arith.constant 0 : index
    %428 = vector.load %arg1[%c104, %c0_80] : memref<128x256xf32, #tpu.memory_space<vmem>>, vector<8x256xf32>
    %cst_81 = arith.constant dense<0.000000e+00> : vector<2x256xf32>
    %429 = tpu.matmul %427, %428, %cst_81 {dimension_numbers = #tpu.dot_dimension_numbers<[1], [0], [0], [1], [0, 0, 1, 1], [], []>} : vector<2x8xf32>, vector<8x256xf32>, vector<2x256xf32> -> vector<2x256xf32>
    %430 = arith.addf %371, %429 : vector<2x256xf32>
    %431 = vector.extract_strided_slice %5 {offsets = [0, 224], sizes = [2, 32], strides = [1, 1]} : vector<2x256xf32> to vector<2x32xf32>
    %cst_82 = arith.constant dense<0.000000e+00> : vector<2x32xf32>
    %432 = tpu.matmul %399, %6, %cst_82 {dimension_numbers = #tpu.dot_dimension_numbers<[1], [0], [0], [1], [0, 0, 1, 1], [], []>} : vector<2x8xf32>, vector<8x32xf32>, vector<2x32xf32> -> vector<2x32xf32>
    %433 = arith.addf %431, %432 : vector<2x32xf32>
    %434 = vector.extract_strided_slice %433 {offsets = [0, 0], sizes = [2, 8], strides = [1, 1]} : vector<2x32xf32> to vector<2x8xf32>
    %435 = arith.negf %434 : vector<2x8xf32>
    %436 = math.exp %435 : vector<2x8xf32>
    %cst_83 = arith.constant 1.000000e+00 : f32
    %437 = vector.broadcast %cst_83 : f32 to vector<2x8xf32>
    %438 = arith.addf %437, %436 : vector<2x8xf32>
    %439 = arith.divf %437, %438 : vector<2x8xf32>
    %440 = vector.extract_strided_slice %433 {offsets = [0, 8], sizes = [2, 8], strides = [1, 1]} : vector<2x32xf32> to vector<2x8xf32>
    %441 = arith.negf %440 : vector<2x8xf32>
    %442 = math.exp %441 : vector<2x8xf32>
    %cst_84 = arith.constant 1.000000e+00 : f32
    %443 = vector.broadcast %cst_84 : f32 to vector<2x8xf32>
    %444 = arith.addf %443, %442 : vector<2x8xf32>
    %445 = arith.divf %443, %444 : vector<2x8xf32>
    %446 = vector.extract_strided_slice %433 {offsets = [0, 16], sizes = [2, 8], strides = [1, 1]} : vector<2x32xf32> to vector<2x8xf32>
    %447 = math.tanh %446 : vector<2x8xf32>
    %448 = vector.extract_strided_slice %433 {offsets = [0, 24], sizes = [2, 8], strides = [1, 1]} : vector<2x32xf32> to vector<2x8xf32>
    %449 = arith.negf %448 : vector<2x8xf32>
    %450 = math.exp %449 : vector<2x8xf32>
    %cst_85 = arith.constant 1.000000e+00 : f32
    %451 = vector.broadcast %cst_85 : f32 to vector<2x8xf32>
    %452 = arith.addf %451, %450 : vector<2x8xf32>
    %453 = arith.divf %451, %452 : vector<2x8xf32>
    %454 = arith.mulf %445, %397 : vector<2x8xf32>
    %455 = arith.mulf %439, %447 : vector<2x8xf32>
    %456 = arith.addf %454, %455 : vector<2x8xf32>
    %457 = math.tanh %456 : vector<2x8xf32>
    %458 = arith.mulf %453, %457 : vector<2x8xf32>
    %459 = tpu.concatenate %458, %427 in 1 : vector<2x8xf32>, vector<2x8xf32> -> vector<2x16xf32>
    %cst_86 = arith.constant dense<0.000000e+00> : vector<2x32xf32>
    %460 = tpu.matmul %459, %7, %cst_86 {dimension_numbers = #tpu.dot_dimension_numbers<[1], [0], [0], [1], [0, 0, 1, 1], [], []>} : vector<2x16xf32>, vector<16x32xf32>, vector<2x32xf32> -> vector<2x32xf32>
    %461 = arith.addf %460, %10 : vector<2x32xf32>
    %462 = vector.extract_strided_slice %461 {offsets = [0, 0], sizes = [2, 8], strides = [1, 1]} : vector<2x32xf32> to vector<2x8xf32>
    %463 = arith.negf %462 : vector<2x8xf32>
    %464 = math.exp %463 : vector<2x8xf32>
    %cst_87 = arith.constant 1.000000e+00 : f32
    %465 = vector.broadcast %cst_87 : f32 to vector<2x8xf32>
    %466 = arith.addf %465, %464 : vector<2x8xf32>
    %467 = arith.divf %465, %466 : vector<2x8xf32>
    %468 = vector.extract_strided_slice %461 {offsets = [0, 8], sizes = [2, 8], strides = [1, 1]} : vector<2x32xf32> to vector<2x8xf32>
    %469 = arith.negf %468 : vector<2x8xf32>
    %470 = math.exp %469 : vector<2x8xf32>
    %cst_88 = arith.constant 1.000000e+00 : f32
    %471 = vector.broadcast %cst_88 : f32 to vector<2x8xf32>
    %472 = arith.addf %471, %470 : vector<2x8xf32>
    %473 = arith.divf %471, %472 : vector<2x8xf32>
    %474 = vector.extract_strided_slice %461 {offsets = [0, 16], sizes = [2, 8], strides = [1, 1]} : vector<2x32xf32> to vector<2x8xf32>
    %475 = math.tanh %474 : vector<2x8xf32>
    %476 = vector.extract_strided_slice %461 {offsets = [0, 24], sizes = [2, 8], strides = [1, 1]} : vector<2x32xf32> to vector<2x8xf32>
    %477 = arith.negf %476 : vector<2x8xf32>
    %478 = math.exp %477 : vector<2x8xf32>
    %cst_89 = arith.constant 1.000000e+00 : f32
    %479 = vector.broadcast %cst_89 : f32 to vector<2x8xf32>
    %480 = arith.addf %479, %478 : vector<2x8xf32>
    %481 = arith.divf %479, %480 : vector<2x8xf32>
    %482 = arith.mulf %473, %425 : vector<2x8xf32>
    %483 = arith.mulf %467, %475 : vector<2x8xf32>
    %484 = arith.addf %482, %483 : vector<2x8xf32>
    %485 = math.tanh %484 : vector<2x8xf32>
    %486 = arith.mulf %481, %485 : vector<2x8xf32>
    %c112 = arith.constant 112 : index
    %c0_90 = arith.constant 0 : index
    %487 = vector.load %arg1[%c112, %c0_90] : memref<128x256xf32, #tpu.memory_space<vmem>>, vector<8x256xf32>
    %cst_91 = arith.constant dense<0.000000e+00> : vector<2x256xf32>
    %488 = tpu.matmul %486, %487, %cst_91 {dimension_numbers = #tpu.dot_dimension_numbers<[1], [0], [0], [1], [0, 0, 1, 1], [], []>} : vector<2x8xf32>, vector<8x256xf32>, vector<2x256xf32> -> vector<2x256xf32>
    %489 = arith.addf %430, %488 : vector<2x256xf32>
    %490 = math.tanh %489 : vector<2x256xf32>
    %c0_92 = arith.constant 0 : index
    %c0_93 = arith.constant 0 : index
    %491 = vector.load %arg2[%c0_92, %c0_93] : memref<464x128xf32, #tpu.memory_space<vmem>>, vector<16x40xf32>
    %c16_94 = arith.constant 16 : index
    %c0_95 = arith.constant 0 : index
    %492 = vector.load %arg2[%c16_94, %c0_95] : memref<464x128xf32, #tpu.memory_space<vmem>>, vector<1x40xf32>
    %cst_96 = arith.constant dense<0.000000e+00> : vector<2x40xf32>
    %493 = tpu.matmul %0, %491, %cst_96 {dimension_numbers = #tpu.dot_dimension_numbers<[1], [0], [0], [1], [0, 0, 1, 1], [], []>} : vector<2x16xf32>, vector<16x40xf32>, vector<2x40xf32> -> vector<2x40xf32>
    %494 = vector.broadcast %492 : vector<1x40xf32> to vector<2x40xf32>
    %495 = arith.addf %493, %494 : vector<2x40xf32>
    %c24_97 = arith.constant 24 : index
    %c0_98 = arith.constant 0 : index
    %496 = vector.load %arg2[%c24_97, %c0_98] : memref<464x128xf32, #tpu.memory_space<vmem>>, vector<256x80xf32>
    %c280 = arith.constant 280 : index
    %c0_99 = arith.constant 0 : index
    %497 = vector.load %arg2[%c280, %c0_99] : memref<464x128xf32, #tpu.memory_space<vmem>>, vector<1x80xf32>
    %cst_100 = arith.constant dense<0.000000e+00> : vector<2x80xf32>
    %498 = tpu.matmul %490, %496, %cst_100 {dimension_numbers = #tpu.dot_dimension_numbers<[1], [0], [0], [1], [0, 0, 1, 1], [], []>} : vector<2x256xf32>, vector<256x80xf32>, vector<2x80xf32> -> vector<2x80xf32>
    %499 = vector.broadcast %497 : vector<1x80xf32> to vector<2x80xf32>
    %500 = arith.addf %498, %499 : vector<2x80xf32>
    %501 = math.tanh %500 : vector<2x80xf32>
    %c288 = arith.constant 288 : index
    %c0_101 = arith.constant 0 : index
    %502 = vector.load %arg2[%c288, %c0_101] : memref<464x128xf32, #tpu.memory_space<vmem>>, vector<80x40xf32>
    %c368 = arith.constant 368 : index
    %c0_102 = arith.constant 0 : index
    %503 = vector.load %arg2[%c368, %c0_102] : memref<464x128xf32, #tpu.memory_space<vmem>>, vector<1x40xf32>
    %cst_103 = arith.constant dense<0.000000e+00> : vector<2x40xf32>
    %504 = tpu.matmul %501, %502, %cst_103 {dimension_numbers = #tpu.dot_dimension_numbers<[1], [0], [0], [1], [0, 0, 1, 1], [], []>} : vector<2x80xf32>, vector<80x40xf32>, vector<2x40xf32> -> vector<2x40xf32>
    %505 = vector.broadcast %503 : vector<1x40xf32> to vector<2x40xf32>
    %506 = arith.addf %504, %505 : vector<2x40xf32>
    %507 = math.tanh %506 : vector<2x40xf32>
    %c376 = arith.constant 376 : index
    %c0_104 = arith.constant 0 : index
    %508 = vector.load %arg2[%c376, %c0_104] : memref<464x128xf32, #tpu.memory_space<vmem>>, vector<40x128xf32>
    %c416 = arith.constant 416 : index
    %c0_105 = arith.constant 0 : index
    %509 = vector.load %arg2[%c416, %c0_105] : memref<464x128xf32, #tpu.memory_space<vmem>>, vector<40x128xf32>
    %c456 = arith.constant 456 : index
    %c0_106 = arith.constant 0 : index
    %510 = vector.load %arg2[%c456, %c0_106] : memref<464x128xf32, #tpu.memory_space<vmem>>, vector<1x128xf32>
    %cst_107 = arith.constant dense<0.000000e+00> : vector<2x128xf32>
    %511 = tpu.matmul %507, %508, %cst_107 {dimension_numbers = #tpu.dot_dimension_numbers<[1], [0], [0], [1], [0, 0, 1, 1], [], []>} : vector<2x40xf32>, vector<40x128xf32>, vector<2x128xf32> -> vector<2x128xf32>
    %cst_108 = arith.constant dense<0.000000e+00> : vector<2x128xf32>
    %512 = tpu.matmul %495, %509, %cst_108 {dimension_numbers = #tpu.dot_dimension_numbers<[1], [0], [0], [1], [0, 0, 1, 1], [], []>} : vector<2x40xf32>, vector<40x128xf32>, vector<2x128xf32> -> vector<2x128xf32>
    %513 = arith.addf %511, %512 : vector<2x128xf32>
    %514 = vector.broadcast %510 : vector<1x128xf32> to vector<2x128xf32>
    %515 = arith.addf %513, %514 : vector<2x128xf32>
    %516 = math.tanh %515 : vector<2x128xf32>
    %c0_109 = arith.constant 0 : index
    %c0_110 = arith.constant 0 : index
    %517 = vector.load %arg3[%c0_109, %c0_110] : memref<2x128xf32, #tpu.memory_space<vmem>>, vector<2x128xf32>
    tpu.vector_store %arg3[%c0_109, %c0_110], %516 {strides = array<i32>} : memref<2x128xf32, #tpu.memory_space<vmem>>, vector<2x128xf32>,
    return
  }
}

</mosaic_0001>

<bundles_post_ra>
// kernel: tpu_custom_call.1
= control target key start
LH: loop header
LB: loop body
LE: loop exit
PB: predicated region body
PF: predicated region fallthrough
CT: control target
= control target key end

     0   :  { %8 = vsyncpa [#allocation3], 0  ;;  %s3948_s0 = inlined_call_operand.hbm [shape: f32[2,16], index: 0, kind: input, shape index: {}]   ;;  %s3949_s1 = inlined_call_operand.hbm [shape: f32[128,256], index: 1, kind: input, shape index: {}]   ;;  %s3950_s2 = inlined_call_operand.hbm [shape: f32[464,128], index: 2, kind: input, shape index: {}]   ;;  %s3951_s3 = inlined_call_operand.hbm [shape: f32[2,128], index: 3, kind: output, shape index: {}]  }
   0x1   :  { %9 = vsyncpa [#allocation6], 0 }
   0x2   :  { %10 = vsyncpa [#allocation4], 0  ;;  %s3587_s12 = smov [#allocation5]   ;;  %s3493_s16 = scalar_lea.hbm %s3949_s1, 4096 }
   0x3   :  { %s26_s13 = sshll.u32 %s3587_s12, 4  ;;  %p3494_p0 = scmp.ne.s32.totalorder %s3949_s1, %s3493_s16  ;;  %s27_s13 = int_to_ptr.vmem [resolvable:$true] %s26_s13 }
   0x4   :  { %p3497_p1 = scmp.lt.u32.totalorder %s3493_s16, %s3949_s1 }
   0x6   :  { %p3499_p2 = pnand %p3497_p1, %p3494_p0 }
   0x8   :  { %3502 = shalt.err (!%p3499_p2)
}
   0x9   :  { %s3503_s21 = scalar_lea.vmem %s27_s13, 4096  ;;  %p3508_p4 = scmp.lt.s32.totalorder %s27_s13, %s27_s13 }
   0xa   :  { %p3504_p3 = scmp.ne.s32.totalorder %s27_s13, %s3503_s21  ;;  %p3509_p5 = scmp.lt.s32.totalorder %s3503_s21, %s3503_s21 }
   0xc   :  { %p3510_p6 = por %p3509_p5, %p3508_p4 }
   0xe   :  { %p3511_p7 = pnand %p3510_p6, %p3504_p3 }
  0x10   :  { %3514 = shalt.err (!%p3511_p7)
}
  0x11   :  { %s3588_s22 = smov 256   ;;  %s3589_s23 = smov 16  }
  0x12   :  { %32 = dma.hbm_to_vmem [thread:$0]  %s3949_s1, 4096, %s27_s13, [#allocation6], %s3588_s22, %s3588_s22, %s3589_s23  }
  0x13   :  { %s3590_s26 = smov [#allocation2]   ;;  %s3591_s28 = smov [#allocation7]  }
  0x14   :  { %s17_s27 = sshll.u32 %s3590_s26, 4  ;;  %s38_s29 = sshll.u32 %s3591_s28, 4  ;;  %s18_s27 = int_to_ptr.vmem [resolvable:$true] %s17_s27  ;;  %s39_s29 = int_to_ptr.vmem [resolvable:$true] %s38_s29 }
  0x15   :  { %s3515_s5 = scalar_lea.hbm %s3948_s0, 32 }
  0x16   :  { %p3516_p8 = scmp.ne.s32.totalorder %s3948_s0, %s3515_s5  ;;  %p3519_p9 = scmp.lt.u32.totalorder %s3515_s5, %s3948_s0 }
  0x18   :  { %p3521_p10 = pnand %p3519_p9, %p3516_p8 }
  0x1a   :  { %3524 = shalt.err (!%p3521_p10)
}
  0x1b   :  { %s3525_s1 = scalar_lea.vmem %s18_s27, 32  ;;  %p3530_p12 = scmp.lt.s32.totalorder %s18_s27, %s18_s27 }
  0x1c   :  { %p3526_p11 = scmp.ne.s32.totalorder %s18_s27, %s3525_s1  ;;  %p3531_p13 = scmp.lt.s32.totalorder %s3525_s1, %s3525_s1 }
  0x1e   :  { %p3532_p0 = por %p3531_p13, %p3530_p12 }
  0x20   :  { %p3533_p1 = pnand %p3532_p0, %p3526_p11 }
  0x22   :  { %3536 = shalt.err (!%p3533_p1)
}
  0x23   :  { %20 = dma.hbm_to_vmem [thread:$0]  %s3948_s0, 32, %s18_s27, [#allocation3]  }
  0x24   :  { %s3537_s14 = scalar_lea.hbm %s3950_s2, 7424 }
  0x25   :  { %p3538_p2 = scmp.ne.s32.totalorder %s3950_s2, %s3537_s14  ;;  %p3541_p3 = scmp.lt.u32.totalorder %s3537_s14, %s3950_s2 }
  0x27   :  { %p3543_p4 = pnand %p3541_p3, %p3538_p2 }
  0x29   :  { %3546 = shalt.err (!%p3543_p4)
}
  0x2a   :  { %s3547_s19 = scalar_lea.vmem %s39_s29, 7424  ;;  %p3552_p6 = scmp.lt.s32.totalorder %s39_s29, %s39_s29 }
  0x2b   :  { %p3548_p5 = scmp.ne.s32.totalorder %s39_s29, %s3547_s19  ;;  %p3553_p7 = scmp.lt.s32.totalorder %s3547_s19, %s3547_s19 }
  0x2d   :  { %p3554_p8 = por %p3553_p7, %p3552_p6 }
  0x2f   :  { %p3555_p9 = pnand %p3554_p8, %p3548_p5 }
  0x31   :  { %3558 = shalt.err (!%p3555_p9)
}
  0x32   :  { %s3592_s0 = smov 128   ;;  %s3593_s20 = smov 8  }
  0x33   :  { %44 = dma.hbm_to_vmem [thread:$0]  %s3950_s2, 7424, %s39_s29, [#allocation6], %s3592_s0, %s3592_s0, %s3593_s20  }
  0x34   :  { %3581 = dma.done.wait [#allocation3], 32  }
  0x35   :  { %3582 = vsyncadd [#allocation3], 4294967264 }
  0x36   :  { %3583 = dma.done.wait [#allocation6], 11520  }
  0x37   :  { %3584 = vsyncadd [#allocation6], 4294955776  ;;  %v3594_v0 = vmov 0.0   ;;  %v56_v1 = vld [vmem:[#allocation5 + $0x8] sm:$0xff]  ;;  %v58_v2 = vld [vmem:[#allocation5 + $0x18] sm:$0xff]  ;;  %vm72_vm0 = vcmask 130048   ;;  %v62_v9 = vlaneseq }
  0x38   :  { %140 = vmatprep.mubr.f32.mxu1 %v3594_v0  ;;  %436 = vmatprep.mubr.f32.mxu0 %v3594_v0  ;;  %v55_v3 = vld [vmem:[#allocation5] sm:$0xff]  ;;  %v3230_v4 = vpack.c.bf16 %v58_v2, %v56_v1  ;;  %v57_v5 = vld [vmem:[#allocation5 + $0x10] sm:$0xff]  ;;  %v54_v7 = vld [vmem:[#allocation2] sm:$0x3]  ;;  %vm3595_vm1 = vmmov 0   ;;  %s3596_s2 = smov 112  }
  0x39   :  { %v3232_v6 = vpack.c.bf16 %v57_v5, %v55_v3  ;;  %v3666_v8 = vld [vmem:[#allocation5 + $0x30] sm:$0xff]  ;;  %v3675_v10 = vshrl.u32 %v62_v9, 7  ;;  %v3678_v12 = vld [vmem:[#allocation5 + $0x20] ss:$8 sm:$0x3]  ;;  %v3597_v32 = vmov 0.0|0.0  }
  0x3a   :  { %3231 = vmatprep.subr.bf16.mxu1 %v3230_v4  ;;  %v148_v30 = vld [vmem:[#allocation5 + $0x40] sm:$0xff]  ;;  %v149_v31 = vld [vmem:[#allocation5 + $0x50] sm:$0xff]  ;;  %s3598_s24 = smov 104   ;;  %vm164_vm2 = vcmask 64512   ;;  %s3599_s25 = smov 32   ;;  %vm2673_vm3 = vcmask 654336  }
  0x3b   :  { %3233 = vmatpush1.bf16.msra.mxu1 %v3232_v6  ;;  %v64_v11 = vsub.s32 0, %v3675_v10  ;;  %v3691_v33 = vpack.c.bf16 %v149_v31, %v148_v30  ;;  %v3708_v39 = vld [vmem:[#allocation5 + $0x60] ss:$0 sm:$0xff]  ;;  %v366_v6 = vld [vmem:[#allocation5 + $0x78] sm:$0xff]  ;;  %s3600_s26 = smov 72   ;;  %s3601_s27 = smov 64  }
  0x3c   :  { %3078 = vmatprep.subr.mxu1 %v3594_v0  ;;  %372 = vmatprep.subr.mxu0 %v366_v6  ;;  %s3602_s28 = smov 40   ;;  %s3603_s29 = smov 96   ;;  %vm2759_vm4 = vcmask 326656  }
  0x3d   :  { %v65_v13 = vrot.slane %v3678_v12, %v64_v11 }
  0x3e   :  { %2929 = vmatmul.mubr.msk.f32.vlgmr.msra.gmra.mrb[0].mxu1 %vm72_vm0, %v54_v7  ;;  %v365_v7 = vld [vmem:[#allocation5 + $0x70] sm:$0xff] }
  0x3f   :  { %3079 = vmatpush3.msra.mxu1 %v3666_v8  ;;  %3080 = vmatprep.mubr.msk.f32.mxu1 %vm3595_vm1, %v3594_v0 }
  0x40   :  { %3234 = vmatprep.subr.bf16.mxu1 %v3597_v32  ;;  %373 = vmatpush1.msra.mxu0 %v365_v7 }
  0x41   :  { %3237 = vmatprep.subr.bf16.mxu0 %v3597_v32 }
  0x42   :  { %3081 = vmatmul.mubr.f32.vlgmr.msra.gmra.mrb[2].mxu1 %v3594_v0 }
  0x43   :  { %3087 = vmatprep.mubr.msk.f32.mxu1 %vm3595_vm1, %v3594_v0  ;;  %3236 = vmatpush3.bf16.msra.mxu1 %v3691_v33 }
  0x44   :  { %3090 = vmatprep.subr.mxu1 %v3594_v0 }
 0x111   :  { %v142_v14 = vpop.f32.mrb[0].mxu1 }
 0x112   :  { %v3683_v15 = vpop.f32.mrb[1].mxu1  ;;  %v3685_v16 = vadd.f32 %v142_v14, %v65_v13 }
 0x115   :  { %v234_v17 = vpop.f32.mrb[2].mxu1 }
 0x116   :  { %v238_v18 = vadd.f32 %v234_v17, %v3685_v16  ;;  %v3082_v19 = vpop.f32.mrb[3].mxu1 }
 0x118   :  { %3354 = vtanh.f32 %v238_v18  ;;  %v2930_v21 = vmul.f32 -1.442695, %v238_v18 }
 0x11a   :  { %3356 = vpow2.f32 %v2930_v21 }
 0x122   :  { %v3355_v20 = vpop.eup %3354 }
 0x123   :  { %248 = vrot.lane.b32.xlu0 %v3355_v20, %s3596_s2 }
 0x124   :  { %v3357_v22 = vpop.eup %3356 }
 0x125   :  { %v242_v23 = vadd.f32 1.0, %v3357_v22 }
 0x127   :  { %3358 = vrcp.f32 %v242_v23 }
 0x131   :  { %v3359_v24 = vpop.eup %3358 }
 0x132   :  { %v246_v27 = vmul.f32 0.0, %v3359_v24 }
 0x195   :  { %v249_v25 = vpop.permute.xlu0 %248 }
 0x196   :  { %v251_v26 = vmul.f32 %v3359_v24, %v249_v25 }
 0x198   :  { %253 = vrot.lane.b32.xlu0 %v251_v26, %s3593_s20 }
 0x20a   :  { %v254_v28 = vpop.permute.xlu0 %253 }
 0x20b   :  { %v256_v29 = vadd.f32 %v254_v28, %v246_v27 }
 0x20d   :  { %3360 = vtanh.f32 %v256_v29 }
 0x217   :  { %v3361_v34 = vpop.eup %3360 }
 0x218   :  { %259 = vrot.lane.b32.xlu1 %v3361_v34, %s3589_s23 }
 0x28a   :  { %v260_v35 = vpop.permute.xlu1 %259 }
 0x28b   :  { %v262_v36 = vmul.f32 %v3359_v24, %v260_v35 }
 0x28d   :  { %264 = vrot.lane.b32.xlu1 %v262_v36, %s3598_s24 }
 0x2ff   :  { %v265_v37 = vpop.permute.xlu1 %264 }
 0x300   :  { %v267_v38 = vsel %vm164_vm2, %v265_v37, 0.0 }
 0x301   :  { %3088 = vmatmul.mubr.msk.f32.vlgmr.msra.gmra.mrb[4].mxu1 %vm72_vm0, %v267_v38 }
 0x302   :  { %3091 = vmatpush3.msra.mxu1 %v3666_v8  ;;  %3092 = vmatprep.mubr.msk.f32.mxu1 %vm3595_vm1, %v3594_v0 }
 0x303   :  { %3102 = vmatprep.subr.mxu1 %v3594_v0 }
 0x305   :  { %3093 = vmatmul.mubr.msk.f32.vlgmr.msra.gmra.mrb[6].mxu1 %vm164_vm2, %v265_v37 }
 0x306   :  { %3103 = vmatpush3.msra.mxu1 %v3666_v8  ;;  %3104 = vmatprep.mubr.msk.f32.mxu1 %vm3595_vm1, %v3594_v0 }
 0x307   :  { %3240 = vmatprep.subr.bf16.mxu1 %v3597_v32 }
 0x3d4   :  { %v337_v40 = vpop.f32.mrb[4].mxu1 }
 0x3d5   :  { %v338_v41 = vadd.f32 %v337_v40, %v3708_v39  ;;  %v3089_v42 = vpop.f32.mrb[5].mxu1 }
 0x3d7   :  { %3362 = vtanh.f32 %v338_v41  ;;  %v2932_v46 = vmul.f32 -1.442695, %v338_v41 }
 0x3d8   :  { %v513_v43 = vpop.f32.mrb[6].mxu1 }
 0x3d9   :  { %518 = vrot.lane.b32.xlu0 %v513_v43, %s3599_s25  ;;  %v3094_v44 = vpop.f32.mrb[7].mxu1  ;;  %3364 = vpow2.f32 %v2932_v46 }
 0x3e1   :  { %v3363_v45 = vpop.eup %3362 }
 0x3e2   :  { %350 = vrot.lane.b32.xlu0 %v3363_v45, %s3596_s2 }
 0x3e3   :  { %v3365_v49 = vpop.eup %3364 }
 0x3e4   :  { %v344_v50 = vadd.f32 1.0, %v3365_v49 }
 0x44b   :  { %v519_v47 = vpop.permute.xlu0 %518 }
 0x44c   :  { %v521_v48 = vadd.f32 %v519_v47, %v3685_v16 }
 0x44e   :  { %3366 = vtanh.f32 %v521_v48  ;;  %v2935_v55 = vmul.f32 -1.442695, %v521_v48 }
 0x44f   :  { %3368 = vrcp.f32 %v344_v50 }
 0x450   :  { %3370 = vpow2.f32 %v2935_v55 }
 0x454   :  { %v351_v52 = vpop.permute.xlu0 %350 }
 0x458   :  { %v3367_v51 = vpop.eup %3366 }
 0x459   :  { %535 = vrot.lane.b32.xlu1 %v3367_v51, %s3596_s2  ;;  %v3369_v53 = vpop.eup %3368 }
 0x45a   :  { %v353_v54 = vmul.f32 %v3369_v53, %v351_v52  ;;  %v3371_v56 = vpop.eup %3370  ;;  %v348_v62 = vmul.f32 0.0, %v3369_v53 }
 0x45b   :  { %v525_v57 = vadd.f32 1.0, %v3371_v56 }
 0x45d   :  { %530 = vrot.lane.b32.xlu1 %v256_v29, %s3599_s25  ;;  %3372 = vrcp.f32 %v525_v57 }
 0x461   :  { %355 = vrot.lane.b32.xlu1 %v353_v54, %s3593_s20 }
 0x467   :  { %v3373_v58 = vpop.eup %3372 }
 0x4cb   :  { %v536_v59 = vpop.permute.xlu1 %535 }
 0x4cc   :  { %v538_v60 = vmul.f32 %v3373_v58, %v536_v59 }
 0x4ce   :  { %540 = vrot.lane.b32.xlu0 %v538_v60, %s3593_s20 }
 0x4cf   :  { %v531_v61 = vpop.permute.xlu1 %530 }
 0x4d0   :  { %v533_v3 = vmul.f32 %v3373_v58, %v531_v61 }
 0x4d3   :  { %v356_v63 = vpop.permute.xlu1 %355 }
 0x4d4   :  { %v3718_v1 = vadd.f32 %v356_v63, %v348_v62 }
 0x4d6   :  { %3374 = vtanh.f32 %v3718_v1 }
 0x4e0   :  { %v3375_v2 = vpop.eup %3374 }
 0x4e1   :  { %361 = vrot.lane.b32.xlu1 %v3375_v2, %s3589_s23 }
 0x540   :  { %v541_v4 = vpop.permute.xlu0 %540 }
 0x541   :  { %v543_v5 = vadd.f32 %v541_v4, %v533_v3 }
 0x543   :  { %3376 = vtanh.f32 %v543_v5 }
 0x54d   :  { %v3377_v9 = vpop.eup %3376 }
 0x54e   :  { %546 = vrot.lane.b32.xlu0 %v3377_v9, %s3589_s23 }
 0x553   :  { %v362_v13 = vpop.permute.xlu1 %361 }
 0x554   :  { %v364_v14 = vmul.f32 %v3369_v53, %v362_v13 }
 0x556   :  { %368 = vrot.lane.b32.xlu1 %v364_v14, %s3598_s24 }
 0x5c0   :  { %v547_v17 = vpop.permute.xlu0 %546 }
 0x5c1   :  { %v549_v18 = vmul.f32 %v3373_v58, %v547_v17 }
 0x5c3   :  { %551 = vrot.lane.b32.xlu0 %v549_v18, %s3600_s26 }
 0x5c7   :  { %554 = vrot.lane.b32.xlu0 %v364_v14, %s3596_s2 }
 0x5c8   :  { %v369_v19 = vpop.permute.xlu1 %368 }
 0x5c9   :  { %2933 = vmatmul.mubr.msk.f32.vlgmr.msra.gmra.mrb[0].mxu0 %vm164_vm2, %v369_v19 }
 0x5ca   :  { %3239 = vmatpush3.bf16.msra.mxu0 %v3691_v33  ;;  %3099 = vmatprep.mubr.msk.f32.mxu0 %vm3595_vm1, %v3594_v0 }
 0x635   :  { %v552_v20 = vpop.permute.xlu0 %551 }
 0x636   :  { %3105 = vmatmul.mubr.msk.f32.vlgmr.msra.gmra.mrb[8].mxu1 %vm164_vm2, %v552_v20 }
 0x637   :  { %3242 = vmatpush3.bf16.msra.mxu1 %v3691_v33  ;;  %3111 = vmatprep.mubr.msk.f32.mxu1 %vm3595_vm1, %v3594_v0 }
 0x638   :  { %3114 = vmatprep.subr.mxu1 %v3594_v0 }
 0x639   :  { %v555_v21 = vpop.permute.xlu0 %554 }
 0x63a   :  { %v557_v22 = vsel %vm164_vm2, %v552_v20, %v555_v21 }
 0x63b   :  { %3100 = vmatmul.mubr.msk.f32.vlgmr.msra.gmra.mrb[2].mxu0 %vm72_vm0, %v557_v22 }
 0x63c   :  { %726 = vmatprep.mubr.f32.mxu0 %v3594_v0 }
 0x709   :  { %v803_v23 = vpop.f32.mrb[8].mxu1 }
 0x70a   :  { %808 = vrot.lane.b32.xlu1 %v803_v23, %s3601_s27  ;;  %v3106_v24 = vpop.f32.mrb[9].mxu1 }
 0x70e   :  { %v627_v25 = vpop.f32.mrb[2].mxu0 }
 0x70f   :  { %v628_v26 = vadd.f32 %v627_v25, %v3708_v39  ;;  %v3101_v27 = vpop.f32.mrb[3].mxu0 }
 0x710   :  { %v655_v27 = vld [vmem:[#allocation5 + $0x80] sm:$0xff] }
 0x711   :  { %3378 = vtanh.f32 %v628_v26  ;;  %v2937_v29 = vmul.f32 -1.442695, %v628_v26 }
 0x713   :  { %3380 = vpow2.f32 %v2937_v29 }
 0x71b   :  { %v3379_v28 = vpop.eup %3378 }
 0x71c   :  { %640 = vrot.lane.b32.xlu0 %v3379_v28, %s3596_s2 }
 0x71d   :  { %v3381_v31 = vpop.eup %3380 }
 0x71e   :  { %v634_v35 = vadd.f32 1.0, %v3381_v31 }
 0x720   :  { %820 = vrot.lane.b32.xlu0 %v543_v5, %s3599_s25 }
 0x77c   :  { %v809_v30 = vpop.permute.xlu1 %808 }
 0x77d   :  { %v811_v34 = vadd.f32 %v809_v30, %v3685_v16 }
 0x77f   :  { %3382 = vtanh.f32 %v811_v34  ;;  %v2940_v41 = vmul.f32 -1.442695, %v811_v34 }
 0x780   :  { %3384 = vrcp.f32 %v634_v35 }
 0x781   :  { %3386 = vpow2.f32 %v2940_v41  ;;  %v945_v41 = vld [vmem:[#allocation5 + $0x90] sm:$0xff] }
 0x789   :  { %v3383_v36 = vpop.eup %3382 }
 0x78a   :  { %825 = vrot.lane.b32.xlu1 %v3383_v36, %s3596_s2  ;;  %v3385_v37 = vpop.eup %3384 }
 0x78b   :  { %v3387_v42 = vpop.eup %3386  ;;  %v638_v47 = vmul.f32 %v3385_v37, %v3718_v1 }
 0x78c   :  { %v815_v43 = vadd.f32 1.0, %v3387_v42 }
 0x78e   :  { %v641_v38 = vpop.permute.xlu0 %640  ;;  %3388 = vrcp.f32 %v815_v43 }
 0x78f   :  { %v643_v40 = vmul.f32 %v3385_v37, %v641_v38  ;;  %v946_v38 = vld [vmem:[#allocation5 + $0x98] sm:$0xff] }
 0x791   :  { %645 = vrot.lane.b32.xlu1 %v643_v40, %s3593_s20 }
 0x792   :  { %v821_v51 = vpop.permute.xlu0 %820 }
 0x798   :  { %v3389_v44 = vpop.eup %3388 }
 0x799   :  { %v823_v52 = vmul.f32 %v3389_v44, %v821_v51  ;;  %v68_v51 = vsub.s32 1, %v3675_v10 }
 0x7fc   :  { %v826_v45 = vpop.permute.xlu1 %825 }
 0x7fd   :  { %v828_v46 = vmul.f32 %v3389_v44, %v826_v45 }
 0x7ff   :  { %830 = vrot.lane.b32.xlu0 %v828_v46, %s3593_s20 }
 0x803   :  { %v646_v48 = vpop.permute.xlu1 %645 }
 0x804   :  { %v648_v49 = vadd.f32 %v646_v48, %v638_v47 }
 0x806   :  { %3390 = vtanh.f32 %v648_v49 }
 0x810   :  { %v3391_v50 = vpop.eup %3390 }
 0x811   :  { %651 = vrot.lane.b32.xlu1 %v3391_v50, %s3589_s23 }
 0x871   :  { %v831_v53 = vpop.permute.xlu0 %830 }
 0x872   :  { %v833_v54 = vadd.f32 %v831_v53, %v823_v52  ;;  %v69_v52 = vrot.slane %v3678_v12, %v68_v51 }
 0x874   :  { %3392 = vtanh.f32 %v833_v54  ;;  %v3800_v53 = vadd.f32 %v3683_v15, %v69_v52 }
 0x87e   :  { %v3393_v55 = vpop.eup %3392 }
 0x87f   :  { %836 = vrot.lane.b32.xlu0 %v3393_v55, %s3589_s23 }
 0x883   :  { %v652_v56 = vpop.permute.xlu1 %651 }
 0x884   :  { %v654_v57 = vmul.f32 %v3385_v37, %v652_v56 }
 0x886   :  { %844 = vrot.lane.b32.xlu0 %v654_v57, %s3596_s2 }
 0x8f1   :  { %v837_v58 = vpop.permute.xlu0 %836 }
 0x8f2   :  { %v839_v59 = vmul.f32 %v3389_v44, %v837_v58 }
 0x8f4   :  { %841 = vrot.lane.b32.xlu1 %v839_v59, %s3602_s28 }
 0x8f8   :  { %v845_v60 = vpop.permute.xlu0 %844 }
 0x966   :  { %v842_v61 = vpop.permute.xlu1 %841 }
 0x967   :  { %v847_v62 = vsel %vm164_vm2, %v842_v61, %v845_v60 }
 0x968   :  { %3112 = vmatmul.mubr.msk.f32.vlgmr.msra.gmra.mrb[10].mxu1 %vm72_vm0, %v847_v62 }
 0x969   :  { %3115 = vmatpush3.msra.mxu1 %v3666_v8  ;;  %3116 = vmatprep.mubr.msk.f32.mxu1 %vm3595_vm1, %v3594_v0 }
 0x96a   :  { %3126 = vmatprep.subr.mxu1 %v3594_v0 }
 0x96c   :  { %3117 = vmatmul.mubr.msk.f32.vlgmr.msra.gmra.mrb[12].mxu1 %vm164_vm2, %v842_v61 }
 0x96d   :  { %3127 = vmatpush3.msra.mxu1 %v3666_v8  ;;  %3128 = vmatprep.mubr.msk.f32.mxu1 %vm3595_vm1, %v3594_v0 }
 0x96e   :  { %3246 = vmatprep.subr.bf16.mxu1 %v3597_v32 }
 0xa3b   :  { %v917_v63 = vpop.f32.mrb[10].mxu1 }
 0xa3c   :  { %v918_v1 = vadd.f32 %v917_v63, %v3708_v39  ;;  %v3113_v2 = vpop.f32.mrb[11].mxu1 }
 0xa3e   :  { %3394 = vtanh.f32 %v918_v1  ;;  %v2942_v6 = vmul.f32 -1.442695, %v918_v1 }
 0xa3f   :  { %v1093_v3 = vpop.f32.mrb[12].mxu1 }
 0xa40   :  { %1098 = vrot.lane.b32.xlu1 %v1093_v3, %s3603_s29  ;;  %v3118_v4 = vpop.f32.mrb[13].mxu1  ;;  %3396 = vpow2.f32 %v2942_v6 }
 0xa48   :  { %v3395_v5 = vpop.eup %3394 }
 0xa49   :  { %930 = vrot.lane.b32.xlu0 %v3395_v5, %s3596_s2 }
 0xa4a   :  { %v3397_v7 = vpop.eup %3396 }
 0xa4b   :  { %v924_v9 = vadd.f32 1.0, %v3397_v7 }
 0xa4d   :  { %3398 = vrcp.f32 %v924_v9 }
 0xa57   :  { %v3399_v17 = vpop.eup %3398 }
 0xa58   :  { %v928_v24 = vmul.f32 %v3399_v17, %v648_v49 }
 0xab2   :  { %v1099_v13 = vpop.permute.xlu1 %1098 }
 0xab3   :  { %v1101_v14 = vadd.f32 %v1099_v13, %v3685_v16  ;;  %v656_v16 = vld [vmem:[#allocation5 + $0x88] sm:$0xff] }
 0xab4   :  { %662 = vmatprep.subr.mxu0 %v656_v16 }
 0xab5   :  { %3400 = vtanh.f32 %v1101_v14  ;;  %v2945_v21 = vmul.f32 -1.442695, %v1101_v14  ;;  %663 = vmatpush1.msra.mxu0 %v655_v27 }
 0xab6   :  { %952 = vmatprep.subr.mxu0 %v946_v38 }
 0xab7   :  { %3402 = vpow2.f32 %v2945_v21 }
 0xabb   :  { %v931_v18 = vpop.permute.xlu0 %930 }
 0xabc   :  { %v933_v19 = vmul.f32 %v3399_v17, %v931_v18 }
 0xabe   :  { %935 = vrot.lane.b32.xlu0 %v933_v19, %s3593_s20 }
 0xabf   :  { %v3401_v20 = vpop.eup %3400 }
 0xac0   :  { %1115 = vrot.lane.b32.xlu1 %v3401_v20, %s3596_s2 }
 0xac1   :  { %v3403_v22 = vpop.eup %3402 }
 0xac2   :  { %v1105_v23 = vadd.f32 1.0, %v3403_v22 }
 0xac4   :  { %1110 = vrot.lane.b32.xlu1 %v833_v54, %s3599_s25  ;;  %3404 = vrcp.f32 %v1105_v23 }
 0xace   :  { %v3405_v28 = vpop.eup %3404 }
 0xb30   :  { %v936_v25 = vpop.permute.xlu0 %935 }
 0xb31   :  { %v3770_v26 = vadd.f32 %v936_v25, %v928_v24 }
 0xb32   :  { %v1116_v29 = vpop.permute.xlu1 %1115 }
 0xb33   :  { %3406 = vtanh.f32 %v3770_v26  ;;  %v1118_v30 = vmul.f32 %v3405_v28, %v1116_v29 }
 0xb35   :  { %1120 = vrot.lane.b32.xlu0 %v1118_v30, %s3593_s20 }
 0xb36   :  { %v1111_v34 = vpop.permute.xlu1 %1110 }
 0xb37   :  { %v1113_v35 = vmul.f32 %v3405_v28, %v1111_v34 }
 0xb3d   :  { %v3407_v31 = vpop.eup %3406 }
 0xb3e   :  { %941 = vrot.lane.b32.xlu1 %v3407_v31, %s3589_s23 }
 0xb42   :  { %658 = vrot.lane.b32.xlu1 %v654_v57, %s3598_s24 }
 0xba7   :  { %v1121_v36 = vpop.permute.xlu0 %1120 }
 0xba8   :  { %v1123_v37 = vadd.f32 %v1121_v36, %v1113_v35 }
 0xbaa   :  { %3408 = vtanh.f32 %v1123_v37 }
 0xbb0   :  { %v942_v40 = vpop.permute.xlu1 %941 }
 0xbb1   :  { %v944_v44 = vmul.f32 %v3399_v17, %v942_v40 }
 0xbb4   :  { %v3409_v42 = vpop.eup %3408  ;;  %v659_v43 = vpop.permute.xlu1 %658 }
 0xbb5   :  { %2938 = vmatmul.mubr.msk.f32.vlgmr.msra.gmra.mrb[0].mxu0 %vm164_vm2, %v659_v43  ;;  %1126 = vrot.lane.b32.xlu0 %v3409_v42, %s3589_s23 }
 0xbb6   :  { %953 = vmatpush1.msra.mxu0 %v945_v41  ;;  %1016 = vmatprep.mubr.f32.mxu0 %v3594_v0 }
 0xbb7   :  { %3243 = vmatprep.subr.bf16.mxu0 %v3597_v32 }
 0xbb9   :  { %948 = vrot.lane.b32.xlu0 %v944_v44, %s3598_s24 }
 0xbbd   :  { %1134 = vrot.lane.b32.xlu0 %v944_v44, %s3596_s2 }
 0xc27   :  { %v1127_v45 = vpop.permute.xlu0 %1126 }
 0xc28   :  { %v1129_v46 = vmul.f32 %v3405_v28, %v1127_v45 }
 0xc2a   :  { %1131 = vrot.lane.b32.xlu1 %v1129_v46, %s3593_s20 }
 0xc2b   :  { %v949_v47 = vpop.permute.xlu0 %948 }
 0xc2c   :  { %2943 = vmatmul.mubr.msk.f32.vlgmr.msra.gmra.mrb[0].mxu0 %vm164_vm2, %v949_v47 }
 0xc2d   :  { %3245 = vmatpush3.bf16.msra.mxu0 %v3691_v33  ;;  %3123 = vmatprep.mubr.msk.f32.mxu0 %vm3595_vm1, %v3594_v0 }
 0xc2f   :  { %v1135_v48 = vpop.permute.xlu0 %1134 }
 0xc9c   :  { %v1132_v49 = vpop.permute.xlu1 %1131 }
 0xc9d   :  { %v1137_v50 = vsel %vm164_vm2, %v1132_v49, %v1135_v48  ;;  %3129 = vmatmul.mubr.msk.f32.vlgmr.msra.gmra.mrb[14].mxu1 %vm164_vm2, %v1132_v49 }
 0xc9e   :  { %3124 = vmatmul.mubr.msk.f32.vlgmr.msra.gmra.mrb[4].mxu0 %vm72_vm0, %v1137_v50  ;;  %3248 = vmatpush3.bf16.msra.mxu1 %v3691_v33 }
 0xc9f   :  { %3135 = vmatprep.mubr.msk.f32.mxu1 %vm3595_vm1, %v3594_v0  ;;  %3138 = vmatprep.subr.mxu1 %v3594_v0 }
 0xca0   :  { %1306 = vmatprep.mubr.f32.mxu0 %v3594_v0 }
 0xd70   :  { %v1383_v54 = vpop.f32.mrb[14].mxu1 }
 0xd71   :  { %v1387_v55 = vadd.f32 %v1383_v54, %v3800_v53  ;;  %v1207_v56 = vpop.f32.mrb[4].mxu0  ;;  %v3130_v57 = vpop.f32.mrb[15].mxu1 }
 0xd72   :  { %v1208_v58 = vadd.f32 %v1207_v56, %v3708_v39  ;;  %v3125_v59 = vpop.f32.mrb[5].mxu0 }
 0xd73   :  { %3410 = vtanh.f32 %v1387_v55  ;;  %v2950_v12 = vmul.f32 -1.442695, %v1387_v55 }
 0xd74   :  { %3412 = vtanh.f32 %v1208_v58  ;;  %v2947_v15 = vmul.f32 -1.442695, %v1208_v58 }
 0xd75   :  { %3414 = vpow2.f32 %v2950_v12 }
 0xd76   :  { %3416 = vpow2.f32 %v2947_v15 }
 0xd7d   :  { %v3411_v60 = vpop.eup %3410 }
 0xd7e   :  { %v3413_v61 = vpop.eup %3412  ;;  %1401 = vrot.lane.b32.xlu0 %v3411_v60, %s3596_s2  ;;  %v1236_v60 = vld [vmem:[#allocation5 + $0xa8] sm:$0xff] }
 0xd7f   :  { %1220 = vrot.lane.b32.xlu1 %v3413_v61, %s3596_s2  ;;  %v3415_v62 = vpop.eup %3414  ;;  %1242 = vmatprep.subr.mxu0 %v1236_v60  ;;  %v1235_v61 = vld [vmem:[#allocation5 + $0xa0] sm:$0xff] }
 0xd80   :  { %v3417_v63 = vpop.eup %3416  ;;  %v1391_v1 = vadd.f32 1.0, %v3415_v62  ;;  %1243 = vmatpush1.msra.mxu0 %v1235_v61 }
 0xd81   :  { %v1214_v2 = vadd.f32 1.0, %v3417_v63 }
 0xd82   :  { %3418 = vrcp.f32 %v1391_v1 }
 0xd83   :  { %1396 = vrot.lane.b32.xlu1 %v1123_v37, %s3599_s25  ;;  %3420 = vrcp.f32 %v1214_v2 }
 0xd8c   :  { %v3419_v3 = vpop.eup %3418 }
 0xd8d   :  { %v3421_v5 = vpop.eup %3420 }
 0xd8e   :  { %v1218_v18 = vmul.f32 %v3421_v5, %v3770_v26 }
 0xdf0   :  { %v1402_v4 = vpop.permute.xlu0 %1401 }
 0xdf1   :  { %v1404_v6 = vmul.f32 %v3419_v3, %v1402_v4  ;;  %v1221_v7 = vpop.permute.xlu1 %1220 }
 0xdf2   :  { %v1223_v9 = vmul.f32 %v3421_v5, %v1221_v7 }
 0xdf3   :  { %1406 = vrot.lane.b32.xlu1 %v1404_v6, %s3593_s20  ;;  %v1521_v6 = vld [vmem:[#allocation5 + $0xb0] sm:$0xff] }
 0xdf4   :  { %1225 = vrot.lane.b32.xlu0 %v1223_v9, %s3593_s20 }
 0xdf5   :  { %v1397_v13 = vpop.permute.xlu1 %1396 }
 0xdf6   :  { %v1399_v14 = vmul.f32 %v3419_v3, %v1397_v13 }
 0xe65   :  { %v1407_v17 = vpop.permute.xlu1 %1406 }
 0xe66   :  { %v1409_v19 = vadd.f32 %v1407_v17, %v1399_v14  ;;  %v1226_v20 = vpop.permute.xlu0 %1225 }
 0xe67   :  { %v1228_v21 = vadd.f32 %v1226_v20, %v1218_v18 }
 0xe68   :  { %3422 = vtanh.f32 %v1409_v19 }
 0xe69   :  { %3424 = vtanh.f32 %v1228_v21 }
 0xe72   :  { %v3423_v22 = vpop.eup %3422 }
 0xe73   :  { %v3425_v23 = vpop.eup %3424  ;;  %1412 = vrot.lane.b32.xlu1 %v3423_v22, %s3589_s23 }
 0xe74   :  { %1231 = vrot.lane.b32.xlu0 %v3425_v23, %s3589_s23 }
 0xee5   :  { %v1413_v24 = vpop.permute.xlu1 %1412 }
 0xee6   :  { %v1415_v25 = vmul.f32 %v3419_v3, %v1413_v24  ;;  %v1232_v16 = vpop.permute.xlu0 %1231 }
 0xee7   :  { %v1234_v27 = vmul.f32 %v3421_v5, %v1232_v16  ;;  %v1522_v5 = vld [vmem:[#allocation5 + $0xb8] sm:$0xff] }
 0xee8   :  { %1417 = vrot.lane.b32.xlu0 %v1415_v25, %s3598_s24  ;;  %1528 = vmatprep.subr.mxu0 %v1522_v5 }
 0xee9   :  { %1420 = vrot.lane.b32.xlu1 %v1234_v27, %s3596_s2 }
 0xf5a   :  { %v1418_v26 = vpop.permute.xlu0 %1417 }
 0xf5b   :  { %v1421_v28 = vpop.permute.xlu1 %1420 }
 0xf5c   :  { %v1423_v29 = vsel %vm164_vm2, %v1418_v26, %v1421_v28 }
 0xf5d   :  { %3136 = vmatmul.mubr.msk.f32.vlgmr.msra.gmra.mrb[16].mxu1 %vm72_vm0, %v1423_v29 }
 0xf5e   :  { %3139 = vmatpush3.msra.mxu1 %v3666_v8  ;;  %3140 = vmatprep.mubr.msk.f32.mxu1 %vm3595_vm1, %v3594_v0 }
 0xf5f   :  { %3150 = vmatprep.subr.mxu1 %v3594_v0 }
 0xf61   :  { %3141 = vmatmul.mubr.msk.f32.vlgmr.msra.gmra.mrb[18].mxu1 %vm164_vm2, %v1418_v26 }
 0xf62   :  { %3151 = vmatpush3.msra.mxu1 %v3666_v8  ;;  %3152 = vmatprep.mubr.msk.f32.mxu1 %vm3595_vm1, %v3594_v0 }
 0xf63   :  { %3252 = vmatprep.subr.bf16.mxu1 %v3597_v32 }
0x1030   :  { %v1493_v30 = vpop.f32.mrb[16].mxu1 }
0x1031   :  { %v1494_v31 = vadd.f32 %v1493_v30, %v3708_v39  ;;  %v3137_v34 = vpop.f32.mrb[17].mxu1 }
0x1033   :  { %3426 = vtanh.f32 %v1494_v31  ;;  %v2952_v38 = vmul.f32 -1.442695, %v1494_v31 }
0x1034   :  { %v1669_v35 = vpop.f32.mrb[18].mxu1 }
0x1035   :  { %1674 = vrot.lane.b32.xlu0 %v1669_v35, %s3599_s25  ;;  %v3142_v36 = vpop.f32.mrb[19].mxu1  ;;  %3428 = vpow2.f32 %v2952_v38 }
0x103d   :  { %v3427_v37 = vpop.eup %3426 }
0x103e   :  { %1506 = vrot.lane.b32.xlu0 %v3427_v37, %s3596_s2 }
0x103f   :  { %v3429_v42 = vpop.eup %3428 }
0x1040   :  { %v1500_v43 = vadd.f32 1.0, %v3429_v42 }
0x10a7   :  { %v1675_v40 = vpop.permute.xlu0 %1674 }
0x10a8   :  { %v1677_v41 = vadd.f32 %v1675_v40, %v3800_v53 }
0x10aa   :  { %3430 = vtanh.f32 %v1677_v41  ;;  %v2955_v48 = vmul.f32 -1.442695, %v1677_v41 }
0x10ab   :  { %3432 = vrcp.f32 %v1500_v43 }
0x10ac   :  { %3434 = vpow2.f32 %v2955_v48 }
0x10b0   :  { %v1507_v45 = vpop.permute.xlu0 %1506 }
0x10b4   :  { %v3431_v44 = vpop.eup %3430 }
0x10b5   :  { %1691 = vrot.lane.b32.xlu1 %v3431_v44, %s3596_s2  ;;  %v3433_v46 = vpop.eup %3432 }
0x10b6   :  { %v1509_v47 = vmul.f32 %v3433_v46, %v1507_v45  ;;  %v3435_v49 = vpop.eup %3434  ;;  %v1504_v57 = vmul.f32 %v3433_v46, %v1228_v21 }
0x10b7   :  { %v1681_v50 = vadd.f32 1.0, %v3435_v49 }
0x10b9   :  { %1686 = vrot.lane.b32.xlu1 %v1409_v19, %s3599_s25  ;;  %3436 = vrcp.f32 %v1681_v50 }
0x10bd   :  { %1511 = vrot.lane.b32.xlu1 %v1509_v47, %s3593_s20 }
0x10c3   :  { %v3437_v52 = vpop.eup %3436 }
0x1127   :  { %v1692_v54 = vpop.permute.xlu1 %1691 }
0x1128   :  { %v1694_v55 = vmul.f32 %v3437_v52, %v1692_v54 }
0x112a   :  { %1696 = vrot.lane.b32.xlu0 %v1694_v55, %s3593_s20 }
0x112b   :  { %v1687_v56 = vpop.permute.xlu1 %1686 }
0x112c   :  { %v1689_v15 = vmul.f32 %v3437_v52, %v1687_v56 }
0x112f   :  { %v1512_v58 = vpop.permute.xlu1 %1511 }
0x1130   :  { %v3833_v59 = vadd.f32 %v1512_v58, %v1504_v57 }
0x1132   :  { %3438 = vtanh.f32 %v3833_v59 }
0x113c   :  { %v3439_v12 = vpop.eup %3438 }
0x113d   :  { %1517 = vrot.lane.b32.xlu1 %v3439_v12, %s3589_s23 }
0x1141   :  { %1238 = vrot.lane.b32.xlu1 %v1234_v27, %s3598_s24 }
0x119c   :  { %v1697_v62 = vpop.permute.xlu0 %1696 }
0x119d   :  { %v1699_v63 = vadd.f32 %v1697_v62, %v1689_v15 }
0x119f   :  { %3440 = vtanh.f32 %v1699_v63 }
0x11a9   :  { %v3441_v1 = vpop.eup %3440 }
0x11aa   :  { %1702 = vrot.lane.b32.xlu0 %v3441_v1, %s3589_s23 }
0x11af   :  { %v1518_v2 = vpop.permute.xlu1 %1517 }
0x11b0   :  { %v1520_v3 = vmul.f32 %v3433_v46, %v1518_v2 }
0x11b2   :  { %1710 = vrot.lane.b32.xlu1 %v1520_v3, %s3596_s2 }
0x11b3   :  { %v1239_v4 = vpop.permute.xlu1 %1238 }
0x11b4   :  { %2948 = vmatmul.mubr.msk.f32.vlgmr.msra.gmra.mrb[0].mxu0 %vm164_vm2, %v1239_v4 }
0x11b5   :  { %1592 = vmatprep.mubr.f32.mxu0 %v3594_v0  ;;  %1529 = vmatpush1.msra.mxu0 %v1521_v6 }
0x11b6   :  { %3249 = vmatprep.subr.bf16.mxu0 %v3597_v32 }
0x121c   :  { %v1703_v7 = vpop.permute.xlu0 %1702 }
0x121d   :  { %v1705_v9 = vmul.f32 %v3437_v52, %v1703_v7 }
0x121f   :  { %1707 = vrot.lane.b32.xlu0 %v1705_v9, %s3600_s26 }
0x1223   :  { %1524 = vrot.lane.b32.xlu0 %v1520_v3, %s3598_s24 }
0x1224   :  { %v1711_v17 = vpop.permute.xlu1 %1710 }
0x1291   :  { %v1708_v13 = vpop.permute.xlu0 %1707 }
0x1292   :  { %3153 = vmatmul.mubr.msk.f32.vlgmr.msra.gmra.mrb[20].mxu1 %vm164_vm2, %v1708_v13  ;;  %v1713_v18 = vsel %vm164_vm2, %v1708_v13, %v1711_v17 }
0x1293   :  { %3254 = vmatpush3.bf16.msra.mxu1 %v3691_v33  ;;  %3159 = vmatprep.mubr.msk.f32.mxu1 %vm3595_vm1, %v3594_v0 }
0x1294   :  { %3162 = vmatprep.subr.mxu1 %v3594_v0 }
0x1295   :  { %v1525_v14 = vpop.permute.xlu0 %1524 }
0x1296   :  { %2953 = vmatmul.mubr.msk.f32.vlgmr.msra.gmra.mrb[0].mxu0 %vm164_vm2, %v1525_v14 }
0x1297   :  { %3251 = vmatpush3.bf16.msra.mxu0 %v3691_v33  ;;  %3147 = vmatprep.mubr.msk.f32.mxu0 %vm3595_vm1, %v3594_v0 }
0x129a   :  { %3148 = vmatmul.mubr.msk.f32.vlgmr.msra.gmra.mrb[6].mxu0 %vm72_vm0, %v1713_v18 }
0x129b   :  { %1882 = vmatprep.mubr.f32.mxu0 %v3594_v0 }
0x1365   :  { %v1959_v19 = vpop.f32.mrb[20].mxu1 }
0x1366   :  { %1964 = vrot.lane.b32.xlu0 %v1959_v19, %s3601_s27  ;;  %v3154_v20 = vpop.f32.mrb[21].mxu1 }
0x136d   :  { %v1783_v21 = vpop.f32.mrb[6].mxu0 }
0x136e   :  { %v1784_v22 = vadd.f32 %v1783_v21, %v3708_v39  ;;  %v3149_v23 = vpop.f32.mrb[7].mxu0  ;;  %v1811_v21 = vld [vmem:[#allocation5 + $0xc0] sm:$0xff] }
0x1370   :  { %3442 = vtanh.f32 %v1784_v22  ;;  %v2957_v25 = vmul.f32 -1.442695, %v1784_v22 }
0x1372   :  { %3444 = vpow2.f32 %v2957_v25 }
0x137a   :  { %v3443_v24 = vpop.eup %3442 }
0x137b   :  { %1796 = vrot.lane.b32.xlu1 %v3443_v24, %s3596_s2 }
0x137c   :  { %v3445_v26 = vpop.eup %3444 }
0x137d   :  { %v1790_v28 = vadd.f32 1.0, %v3445_v26 }
0x137f   :  { %1976 = vrot.lane.b32.xlu1 %v1699_v63, %s3599_s25 }
0x13d8   :  { %v1965_v16 = vpop.permute.xlu0 %1964 }
0x13d9   :  { %v1967_v27 = vadd.f32 %v1965_v16, %v3800_v53 }
0x13db   :  { %3446 = vtanh.f32 %v1967_v27  ;;  %v2960_v35 = vmul.f32 -1.442695, %v1967_v27 }
0x13dc   :  { %3448 = vrcp.f32 %v1790_v28 }
0x13dd   :  { %3450 = vpow2.f32 %v2960_v35 }
0x13e5   :  { %v3447_v29 = vpop.eup %3446 }
0x13e6   :  { %1981 = vrot.lane.b32.xlu0 %v3447_v29, %s3596_s2  ;;  %v3449_v30 = vpop.eup %3448  ;;  %v2102_v29 = vld [vmem:[#allocation5 + $0xd8] sm:$0xff] }
0x13e7   :  { %v3451_v36 = vpop.eup %3450  ;;  %v1794_v42 = vmul.f32 %v3449_v30, %v3833_v59 }
0x13e8   :  { %v1971_v37 = vadd.f32 1.0, %v3451_v36 }
0x13ea   :  { %3452 = vrcp.f32 %v1971_v37 }
0x13ed   :  { %v1797_v31 = vpop.permute.xlu1 %1796 }
0x13ee   :  { %v1799_v34 = vmul.f32 %v3449_v30, %v1797_v31  ;;  %v2101_v31 = vld [vmem:[#allocation5 + $0xd0] sm:$0xff] }
0x13f0   :  { %1801 = vrot.lane.b32.xlu0 %v1799_v34, %s3593_s20 }
0x13f1   :  { %v1977_v46 = vpop.permute.xlu1 %1976 }
0x13f4   :  { %v3453_v38 = vpop.eup %3452 }
0x13f5   :  { %v1979_v47 = vmul.f32 %v3453_v38, %v1977_v46 }
0x1458   :  { %v1982_v40 = vpop.permute.xlu0 %1981 }
0x1459   :  { %v1984_v41 = vmul.f32 %v3453_v38, %v1982_v40 }
0x145b   :  { %1986 = vrot.lane.b32.xlu1 %v1984_v41, %s3593_s20 }
0x1462   :  { %v1802_v43 = vpop.permute.xlu0 %1801 }
0x1463   :  { %v1804_v44 = vadd.f32 %v1802_v43, %v1794_v42 }
0x1465   :  { %3454 = vtanh.f32 %v1804_v44 }
0x146f   :  { %v3455_v45 = vpop.eup %3454 }
0x1470   :  { %1807 = vrot.lane.b32.xlu0 %v3455_v45, %s3589_s23 }
0x14cd   :  { %v1987_v48 = vpop.permute.xlu1 %1986 }
0x14ce   :  { %v1989_v49 = vadd.f32 %v1987_v48, %v1979_v47 }
0x14d0   :  { %3456 = vtanh.f32 %v1989_v49 }
0x14da   :  { %v3457_v50 = vpop.eup %3456 }
0x14db   :  { %1992 = vrot.lane.b32.xlu1 %v3457_v50, %s3589_s23 }
0x14e2   :  { %v1808_v52 = vpop.permute.xlu0 %1807 }
0x14e3   :  { %v1810_v54 = vmul.f32 %v3449_v30, %v1808_v52 }
0x14e5   :  { %2000 = vrot.lane.b32.xlu1 %v1810_v54, %s3596_s2 }
0x154d   :  { %v1993_v55 = vpop.permute.xlu1 %1992 }
0x154e   :  { %v1995_v56 = vmul.f32 %v3453_v38, %v1993_v55 }
0x1550   :  { %1997 = vrot.lane.b32.xlu0 %v1995_v56, %s3602_s28 }
0x1557   :  { %v2001_v57 = vpop.permute.xlu1 %2000 }
0x15c2   :  { %v1998_v58 = vpop.permute.xlu0 %1997 }
0x15c3   :  { %v2003_v59 = vsel %vm164_vm2, %v1998_v58, %v2001_v57 }
0x15c4   :  { %3160 = vmatmul.mubr.msk.f32.vlgmr.msra.gmra.mrb[22].mxu1 %vm72_vm0, %v2003_v59 }
0x15c5   :  { %3163 = vmatpush3.msra.mxu1 %v3666_v8  ;;  %3164 = vmatprep.mubr.msk.f32.mxu1 %vm3595_vm1, %v3594_v0 }
0x15c6   :  { %3258 = vmatprep.subr.bf16.mxu1 %v3597_v32 }
0x15c8   :  { %3165 = vmatmul.mubr.msk.f32.vlgmr.msra.gmra.mrb[24].mxu1 %vm164_vm2, %v1998_v58  ;;  %v2391_v58 = vld [vmem:[#allocation5 + $0xe0] sm:$0xff] }
0x15c9   :  { %3178 = vmatprep.mubr.msk.f32.mxu1 %vm3595_vm1, %v3594_v0 }
0x1697   :  { %v2073_v60 = vpop.f32.mrb[22].mxu1 }
0x1698   :  { %v2074_v61 = vadd.f32 %v2073_v60, %v3708_v39  ;;  %v3161_v12 = vpop.f32.mrb[23].mxu1  ;;  %v2473_v60 = vld [vmem:[#allocation7] sm:$0xff] }
0x1699   :  { %v2566_v12 = vld [vmem:[#allocation7 + $0x98] sm:$0xff] }
0x169a   :  { %3458 = vtanh.f32 %v2074_v61  ;;  %v2962_v63 = vmul.f32 -1.442695, %v2074_v61  ;;  %v2474_v61 = vld [vmem:[#allocation7 + $0x8] sm:$0xff] }
0x169b   :  { %v2249_v15 = vpop.f32.mrb[24].mxu1 }
0x169c   :  { %2254 = vrot.lane.b32.xlu0 %v2249_v15, %s3603_s29  ;;  %v3166_v62 = vpop.f32.mrb[25].mxu1  ;;  %3460 = vpow2.f32 %v2962_v63  ;;  %v3259_v15 = vpack.c.bf16 %v2474_v61, %v2473_v60  ;;  %v2551_v63 = vld [vmem:[#allocation7 + $0x20] sm:$0xff]  ;;  %v152_v61 = vld [vmem:[#allocation5 + $0xf0] ss:$8 sm:$0x3] }
0x169d   :  { %v2567_v62 = vld [vmem:[#allocation7 + $0xa0] sm:$0xff] }
0x169e   :  { %3260 = vmatpush3.bf16.msra.mxu1 %v3259_v15  ;;  %v161_v15 = vrot.slane %v152_v61, %v68_v51  ;;  %v2664_v51 = vld [vmem:[#allocation7 + $0x150] sm:$0xff] }
0x16a4   :  { %v3459_v8 = vpop.eup %3458 }
0x16a5   :  { %2086 = vrot.lane.b32.xlu1 %v3459_v8, %s3596_s2  ;;  %v2550_v8 = vld [vmem:[#allocation7 + $0x18] sm:$0xff] }
0x16a6   :  { %v3461_v1 = vpop.eup %3460 }
0x16a7   :  { %v2080_v2 = vadd.f32 1.0, %v3461_v1  ;;  %v3261_v1 = vpack.c.bf16 %v2567_v62, %v2566_v12  ;;  %v157_v12 = vrot.slane %v152_v61, %v64_v11  ;;  %v2662_v11 = vld [vmem:[#allocation7 + $0x140] sm:$0xff] }
0x16a9   :  { %3462 = vrcp.f32 %v2080_v2  ;;  %v2568_v2 = vld [vmem:[#allocation7 + $0xa8] sm:$0xff]  ;;  %3262 = vmatprep.subr.bf16.mxu1 %v3261_v1 }
0x16b3   :  { %v3463_v5 = vpop.eup %3462 }
0x16b4   :  { %v2084_v18 = vmul.f32 %v3463_v5, %v1804_v44 }
0x170e   :  { %v2255_v3 = vpop.permute.xlu0 %2254 }
0x170f   :  { %v2257_v4 = vadd.f32 %v2255_v3, %v3800_v53  ;;  %v1812_v53 = vld [vmem:[#allocation5 + $0xc8] sm:$0xff]  ;;  %v2569_v3 = vld [vmem:[#allocation7 + $0xb0] sm:$0xff] }
0x1710   :  { %1818 = vmatprep.subr.mxu0 %v1812_v53  ;;  %v2572_v53 = vld [vmem:[#allocation7 + $0xc8] sm:$0xff] }
0x1711   :  { %3464 = vtanh.f32 %v2257_v4  ;;  %v2965_v13 = vmul.f32 -1.442695, %v2257_v4  ;;  %1819 = vmatpush1.msra.mxu0 %v1811_v21  ;;  %v3263_v4 = vpack.c.bf16 %v2551_v63, %v2550_v8  ;;  %v2573_v21 = vld [vmem:[#allocation7 + $0xd0] sm:$0xff] }
0x1712   :  { %2108 = vmatprep.subr.mxu0 %v2102_v29  ;;  %v2574_v29 = vld [vmem:[#allocation7 + $0xd8] sm:$0xff] }
0x1713   :  { %3466 = vpow2.f32 %v2965_v13  ;;  %v2571_v13 = vld [vmem:[#allocation7 + $0xc0] sm:$0xff] }
0x1717   :  { %v2087_v6 = vpop.permute.xlu1 %2086 }
0x1718   :  { %v2089_v7 = vmul.f32 %v3463_v5, %v2087_v6  ;;  %v2552_v6 = vld [vmem:[#allocation7 + $0x28] sm:$0xff] }
0x171a   :  { %2091 = vrot.lane.b32.xlu1 %v2089_v7, %s3593_s20  ;;  %v2553_v7 = vld [vmem:[#allocation7 + $0x30] sm:$0xff] }
0x171b   :  { %v3465_v9 = vpop.eup %3464 }
0x171c   :  { %2271 = vrot.lane.b32.xlu0 %v3465_v9, %s3596_s2  ;;  %v2570_v9 = vld [vmem:[#allocation7 + $0xb8] sm:$0xff] }
0x171d   :  { %v3467_v14 = vpop.eup %3466 }
0x171e   :  { %v2261_v17 = vadd.f32 1.0, %v3467_v14  ;;  %v3492_v14 = vld [vmem:[#allocation2] sm:$0x3] }
0x171f   :  { %3179 = vmatmul.mubr.msk.f32.vlgmr.msra.gmra.mrb[26].mxu1 %vm72_vm0, %v3492_v14 }
0x1720   :  { %2266 = vrot.lane.b32.xlu0 %v1989_v49, %s3599_s25  ;;  %3468 = vrcp.f32 %v2261_v17  ;;  %3264 = vmatpush3.bf16.msra.mxu1 %v3263_v4  ;;  %v3267_v17 = vpack.c.bf16 %v2553_v7, %v2552_v6  ;;  %v2660_v4 = vld [vmem:[#allocation7 + $0x130] sm:$0xff]  ;;  %v2663_v7 = vld [vmem:[#allocation7 + $0x148] sm:$0xff] }
0x1721   :  { %v3300_v10 = vpack.c.bf16 %v2663_v7, %v2662_v11 }
0x172a   :  { %v3469_v22 = vpop.eup %3468 }
0x178c   :  { %v2092_v19 = vpop.permute.xlu1 %2091 }
0x178d   :  { %v2094_v20 = vadd.f32 %v2092_v19, %v2084_v18  ;;  %v3269_v18 = vpack.c.bf16 %v2571_v13, %v2570_v9  ;;  %v2554_v19 = vld [vmem:[#allocation7 + $0x38] sm:$0xff]  ;;  %v2666_v13 = vld [vmem:[#allocation7 + $0x160] sm:$0xff] }
0x178e   :  { %v2272_v23 = vpop.permute.xlu0 %2271  ;;  %v2665_v9 = vld [vmem:[#allocation7 + $0x158] sm:$0xff] }
0x178f   :  { %3470 = vtanh.f32 %v2094_v20  ;;  %v2274_v24 = vmul.f32 %v3469_v22, %v2272_v23  ;;  %v3303_v14 = vpack.c.bf16 %v2665_v9, %v2664_v51 }
0x1791   :  { %2276 = vrot.lane.b32.xlu1 %v2274_v24, %s3593_s20 }
0x1792   :  { %v2267_v16 = vpop.permute.xlu0 %2266 }
0x1793   :  { %v2269_v27 = vmul.f32 %v3469_v22, %v2267_v16  ;;  %v2556_v16 = vld [vmem:[#allocation7 + $0x48] sm:$0xff] }
0x1799   :  { %v3471_v25 = vpop.eup %3470 }
0x179a   :  { %2097 = vrot.lane.b32.xlu0 %v3471_v25, %s3589_s23  ;;  %v3273_v25 = vpack.c.bf16 %v2573_v21, %v2572_v53 }
0x179e   :  { %1814 = vrot.lane.b32.xlu0 %v1810_v54, %s3598_s24 }
0x1803   :  { %v2277_v26 = vpop.permute.xlu1 %2276 }
0x1804   :  { %v2279_v28 = vadd.f32 %v2277_v26, %v2269_v27  ;;  %v2557_v27 = vld [vmem:[#allocation7 + $0x50] sm:$0xff] }
0x1805   :  { %v3275_v26 = vpack.c.bf16 %v2557_v27, %v2556_v16  ;;  %v2755_v16 = vld [vmem:[#allocation7 + $0x1b0] sm:$0xff]  ;;  %v2756_v27 = vld [vmem:[#allocation7 + $0x1b8] sm:$0xff] }
0x1806   :  { %3472 = vtanh.f32 %v2279_v28 }
0x180c   :  { %v2098_v30 = vpop.permute.xlu0 %2097 }
0x180d   :  { %v2100_v36 = vmul.f32 %v3463_v5, %v2098_v30  ;;  %v3265_v5 = vpack.c.bf16 %v2569_v3, %v2568_v2  ;;  %v2575_v30 = vld [vmem:[#allocation7 + $0xe0] sm:$0xff] }
0x180f   :  { %3266 = vmatprep.subr.bf16.mxu1 %v3265_v5  ;;  %v2661_v5 = vld [vmem:[#allocation7 + $0x138] sm:$0xff] }
0x1810   :  { %v3473_v34 = vpop.eup %3472  ;;  %v1815_v35 = vpop.permute.xlu0 %1814  ;;  %3268 = vmatpush3.bf16.msra.mxu1 %v3267_v17  ;;  %v3297_v6 = vpack.c.bf16 %v2661_v5, %v2660_v4  ;;  %v2667_v17 = vld [vmem:[#allocation7 + $0x168] sm:$0xff] }
0x1811   :  { %2958 = vmatmul.mubr.msk.f32.vlgmr.msra.gmra.mrb[0].mxu0 %vm164_vm2, %v1815_v35  ;;  %2282 = vrot.lane.b32.xlu1 %v3473_v34, %s3589_s23  ;;  %v2558_v34 = vld [vmem:[#allocation7 + $0x58] sm:$0xff]  ;;  %v2559_v35 = vld [vmem:[#allocation7 + $0x60] sm:$0xff] }
0x1812   :  { %2109 = vmatpush1.msra.mxu0 %v2101_v31  ;;  %2172 = vmatprep.mubr.f32.mxu0 %v3594_v0  ;;  %v3277_v31 = vpack.c.bf16 %v2575_v30, %v2574_v29  ;;  %v2969_v29 = vld [vmem:[#allocation7 + $0x10] ss:$0 sm:$0xff]  ;;  %v2757_v30 = vld [vmem:[#allocation7 + $0x1c0] sm:$0xff] }
0x1813   :  { %3255 = vmatprep.subr.bf16.mxu0 %v3597_v32  ;;  %3270 = vmatprep.subr.bf16.mxu1 %v3269_v18  ;;  %v3306_v18 = vpack.c.bf16 %v2667_v17, %v2666_v13 }
0x1815   :  { %2104 = vrot.lane.b32.xlu1 %v2100_v36, %s3598_s24 }
0x1819   :  { %2290 = vrot.lane.b32.xlu1 %v2100_v36, %s3596_s2  ;;  %v3279_v36 = vpack.c.bf16 %v2559_v35, %v2558_v34  ;;  %v2748_v34 = vld [vmem:[#allocation7 + $0x178] sm:$0xff]  ;;  %v2749_v35 = vld [vmem:[#allocation7 + $0x180] sm:$0xff] }
0x1883   :  { %v2283_v37 = vpop.permute.xlu1 %2282 }
0x1884   :  { %v2285_v38 = vmul.f32 %v3469_v22, %v2283_v37  ;;  %v2576_v37 = vld [vmem:[#allocation7 + $0xe8] sm:$0xff] }
0x1886   :  { %2287 = vrot.lane.b32.xlu0 %v2285_v38, %s3593_s20  ;;  %v2577_v38 = vld [vmem:[#allocation7 + $0xf0] sm:$0xff] }
0x1887   :  { %v2105_v40 = vpop.permute.xlu1 %2104 }
0x1888   :  { %2963 = vmatmul.mubr.msk.f32.vlgmr.msra.gmra.mrb[0].mxu0 %vm164_vm2, %v2105_v40  ;;  %v3281_v40 = vpack.c.bf16 %v2577_v38, %v2576_v37  ;;  %v2750_v37 = vld [vmem:[#allocation7 + $0x188] sm:$0xff]  ;;  %v2751_v38 = vld [vmem:[#allocation7 + $0x190] sm:$0xff] }
0x1889   :  { %3257 = vmatpush3.bf16.msra.mxu0 %v3691_v33  ;;  %3171 = vmatprep.mubr.msk.f32.mxu0 %vm3595_vm1, %v3594_v0 }
0x188b   :  { %v2291_v41 = vpop.permute.xlu1 %2290 }
0x18f8   :  { %v2288_v42 = vpop.permute.xlu0 %2287 }
0x18f9   :  { %v2293_v43 = vsel %vm164_vm2, %v2288_v42, %v2291_v41  ;;  %v2560_v41 = vld [vmem:[#allocation7 + $0x68] sm:$0xff]  ;;  %v2561_v42 = vld [vmem:[#allocation7 + $0x70] sm:$0xff] }
0x18fa   :  { %3172 = vmatmul.mubr.msk.f32.vlgmr.msra.gmra.mrb[8].mxu0 %vm72_vm0, %v2293_v43  ;;  %v3283_v43 = vpack.c.bf16 %v2561_v42, %v2560_v41  ;;  %v2752_v41 = vld [vmem:[#allocation7 + $0x198] sm:$0xff]  ;;  %v2972_v42 = vld [vmem:[#allocation7 + $0x170] ss:$0 sm:$0xff] }
0x18fb   :  { %2462 = vmatprep.mubr.f32.mxu0 %v3594_v0 }
0x19cd   :  { %v2363_v44 = vpop.f32.mrb[8].mxu0 }
0x19ce   :  { %v2364_v45 = vadd.f32 %v2363_v44, %v3708_v39  ;;  %v3173_v46 = vpop.f32.mrb[9].mxu0  ;;  %v2392_v39 = vld [vmem:[#allocation5 + $0xe8] sm:$0xff]  ;;  %v2578_v44 = vld [vmem:[#allocation7 + $0xf8] sm:$0xff] }
0x19cf   :  { %2398 = vmatprep.subr.mxu0 %v2392_v39  ;;  %v2562_v46 = vld [vmem:[#allocation7 + $0x78] sm:$0xff]  ;;  %v2658_v39 = vld [vmem:[#allocation7 + $0x120] sm:$0xff] }
0x19d0   :  { %3474 = vtanh.f32 %v2364_v45  ;;  %v2967_v33 = vmul.f32 -1.442695, %v2364_v45  ;;  %2399 = vmatpush1.msra.mxu0 %v2391_v58  ;;  %v2579_v45 = vld [vmem:[#allocation7 + $0x100] sm:$0xff]  ;;  %v2659_v58 = vld [vmem:[#allocation7 + $0x128] sm:$0xff] }
0x19d1   :  { %3293 = vmatprep.subr.bf16.mxu0 %v3597_v32  ;;  %v3294_v60 = vpack.c.bf16 %v2659_v58, %v2658_v39 }
0x19d2   :  { %3476 = vpow2.f32 %v2967_v33  ;;  %v2563_v33 = vld [vmem:[#allocation7 + $0x80] sm:$0xff] }
0x19da   :  { %v3475_v47 = vpop.eup %3474 }
0x19db   :  { %2376 = vrot.lane.b32.xlu0 %v3475_v47, %s3596_s2  ;;  %v3285_v47 = vpack.c.bf16 %v2579_v45, %v2578_v44 }
0x19dc   :  { %v3477_v48 = vpop.eup %3476 }
0x19dd   :  { %v2370_v49 = vadd.f32 1.0, %v3477_v48  ;;  %v2580_v48 = vld [vmem:[#allocation7 + $0x108] sm:$0xff] }
0x19df   :  { %3478 = vrcp.f32 %v2370_v49  ;;  %v2581_v49 = vld [vmem:[#allocation7 + $0x110] sm:$0xff] }
0x19e9   :  { %v3479_v50 = vpop.eup %3478 }
0x19ea   :  { %v2374_v55 = vmul.f32 %v3479_v50, %v2094_v20  ;;  %v2555_v20 = vld [vmem:[#allocation7 + $0x40] sm:$0xff] }
0x19eb   :  { %v3271_v24 = vpack.c.bf16 %v2555_v20, %v2554_v19  ;;  %v2971_v20 = vld [vmem:[#allocation7 + $0x118] ss:$0 sm:$0xff] }
0x19ed   :  { %3272 = vmatpush3.bf16.msra.mxu1 %v3271_v24  ;;  %v2754_v24 = vld [vmem:[#allocation7 + $0x1a8] sm:$0xff] }
0x19ee   :  { %3274 = vmatprep.subr.bf16.mxu1 %v3273_v25 }
0x19f1   :  { %3276 = vmatpush3.bf16.msra.mxu1 %v3275_v26 }
0x19f2   :  { %3278 = vmatprep.subr.bf16.mxu1 %v3277_v31 }
0x19f5   :  { %3280 = vmatpush3.bf16.msra.mxu1 %v3279_v36  ;;  %v3315_v36 = vpack.c.bf16 %v2749_v35, %v2748_v34 }
0x19f6   :  { %3282 = vmatprep.subr.bf16.mxu1 %v3281_v40  ;;  %v3318_v40 = vpack.c.bf16 %v2751_v38, %v2750_v37 }
0x19f9   :  { %3284 = vmatpush3.bf16.msra.mxu1 %v3283_v43 }
0x19fa   :  { %3286 = vmatprep.subr.bf16.mxu1 %v3285_v47 }
0x1a4d   :  { %v2377_v52 = vpop.permute.xlu0 %2376 }
0x1a4e   :  { %v2379_v54 = vmul.f32 %v3479_v50, %v2377_v52  ;;  %v3289_v52 = vpack.c.bf16 %v2581_v49, %v2580_v48  ;;  %v2976_v48 = vld [vmem:[#allocation7 + $0x1c8] ss:$0 sm:$0xff] }
0x1a50   :  { %2381 = vrot.lane.b32.xlu1 %v2379_v54, %s3593_s20  ;;  %v2564_v54 = vld [vmem:[#allocation7 + $0x88] sm:$0xff] }
0x1ac2   :  { %v2382_v56 = vpop.permute.xlu1 %2381 }
0x1ac3   :  { %v2384_v57 = vadd.f32 %v2382_v56, %v2374_v55  ;;  %v2565_v55 = vld [vmem:[#allocation7 + $0x90] sm:$0xff] }
0x1ac4   :  { %v3291_v56 = vpack.c.bf16 %v2565_v55, %v2564_v54 }
0x1ac5   :  { %3480 = vtanh.f32 %v2384_v57  ;;  %v3913_v57 = vpop.f32.mrb[26].mxu1 }
0x1ac6   :  { %v2547_v31 = vadd.f32 %v2969_v29, %v3913_v57 }
0x1acf   :  { %v3481_v59 = vpop.eup %3480 }
0x1ad0   :  { %2387 = vrot.lane.b32.xlu0 %v3481_v59, %s3589_s23  ;;  %v3180_v59 = vpop.f32.mrb[27].mxu1  ;;  %s3604_s23 = smov [#allocation8]  }
0x1ad1   :  { %s2919_s30 = sshll.u32 %s3604_s23, 4  ;;  %s2920_s30 = int_to_ptr.vmem [resolvable:$true] %s2919_s30 }
0x1ad2   :  { %s3559_s4 = scalar_lea.vmem %s2920_s30, 32  ;;  %p3564_p11 = scmp.lt.s32.totalorder %s2920_s30, %s2920_s30 }
0x1ad3   :  { %p3560_p10 = scmp.ne.s32.totalorder %s2920_s30, %s3559_s4  ;;  %p3565_p12 = scmp.lt.s32.totalorder %s3559_s4, %s3559_s4 }
0x1ad5   :  { %p3566_p13 = por %p3565_p12, %p3564_p11 }
0x1ad7   :  { %p3567_p0 = pnand %p3566_p13, %p3560_p10 }
0x1b42   :  { %v2388_v22 = vpop.permute.xlu0 %2387 }
0x1b43   :  { %v2390_v23 = vmul.f32 %v3479_v50, %v2388_v22  ;;  %v3287_v50 = vpack.c.bf16 %v2563_v33, %v2562_v46 }
0x1b45   :  { %2394 = vrot.lane.b32.xlu1 %v2390_v23, %s3598_s24  ;;  %3288 = vmatpush3.bf16.msra.mxu1 %v3287_v50  ;;  %v2753_v23 = vld [vmem:[#allocation7 + $0x1a0] sm:$0xff] }
0x1b46   :  { %3290 = vmatprep.subr.bf16.mxu1 %v3289_v52  ;;  %v3309_v25 = vpack.c.bf16 %v2754_v24, %v2753_v23 }
0x1b49   :  { %3292 = vmatpush3.bf16.msra.mxu1 %v3291_v56 }
0x1bb7   :  { %v2395_v28 = vpop.permute.xlu1 %2394 }
0x1bb8   :  { %2968 = vmatmul.mubr.msk.f32.vlgmr.msra.gmra.mrb[0].mxu0 %vm164_vm2, %v2395_v28  ;;  %v3312_v28 = vpack.c.bf16 %v2756_v27, %v2755_v16 }
0x1bb9   :  { %3201 = vmatprep.mubr.msk.f32.mxu0 %vm3595_vm1, %v3594_v0  ;;  %3295 = vmatpush3.bf16.msra.mxu0 %v3294_v60 }
0x1bba   :  { %3296 = vmatprep.subr.bf16.mxu0 %v3597_v32 }
0x1bbd   :  { %3298 = vmatpush3.bf16.msra.mxu0 %v3297_v6 }
0x1bbe   :  { %3299 = vmatprep.subr.bf16.mxu0 %v3597_v32 }
0x1bc1   :  { %3301 = vmatpush3.bf16.msra.mxu0 %v3300_v10 }
0x1bc2   :  { %3302 = vmatprep.subr.bf16.mxu0 %v3597_v32 }
0x1bc5   :  { %3304 = vmatpush3.bf16.msra.mxu0 %v3303_v14 }
0x1bc6   :  { %3305 = vmatprep.subr.bf16.mxu0 %v3597_v32 }
0x1bc9   :  { %3307 = vmatpush3.bf16.msra.mxu0 %v3306_v18 }
0x1bca   :  { %3308 = vmatprep.subr.bf16.mxu0 %v3597_v32 }
0x1c8b   :  { %v2464_v62 = vpop.f32.mrb[0].mxu0 }
0x1c8c   :  { %v3320_v8 = vadd.f32 %v2464_v62, %v157_v12  ;;  %v2466_v63 = vpop.f32.mrb[1].mxu0 }
0x1c8d   :  { %v3321_v1 = vadd.f32 %v2466_v63, %v161_v15 }
0x1c8f   :  { %3482 = vtanh.f32 %v3321_v1 }
0x1c90   :  { %3484 = vtanh.f32 %v3320_v8 }
0x1c99   :  { %v3483_v2 = vpop.eup %3482 }
0x1c9a   :  { %v3485_v3 = vpop.eup %3484  ;;  %2651 = vmatprep.mubr.f32.mxu1 %v3483_v2 }
0x1c9b   :  { %2652 = vmatmul.mubr.f32.vlgmr.msra.gmra.mrb[28].mxu1 %v3485_v3 }
0x1d6e   :  { %v3052_v19 = vpop.f32.mrb[28].mxu1 }
0x1d6f   :  { %v3053_v53 = vpop.f32.mrb[29].mxu1 }
0x1d70   :  { %v3054_v21 = vadd.f32 %v3053_v53, %v3052_v19 }
0x1d72   :  { %v2654_v22 = vadd.f32 %v3054_v21, %v2971_v20 }
0x1d74   :  { %3486 = vtanh.f32 %v2654_v22 }
0x1d7e   :  { %v3487_v26 = vpop.eup %3486 }
0x1d7f   :  { %3202 = vmatmul.mubr.msk.f32.vlgmr.msra.gmra.mrb[10].mxu0 %vm2673_vm3, %v3487_v26 }
0x1d80   :  { %3310 = vmatpush3.bf16.msra.mxu0 %v3309_v25  ;;  %3214 = vmatprep.mubr.msk.f32.mxu0 %vm3595_vm1, %v3594_v0 }
0x1d81   :  { %3311 = vmatprep.subr.bf16.mxu0 %v3597_v32 }
0x1d84   :  { %3313 = vmatpush3.bf16.msra.mxu0 %v3312_v28 }
0x1d85   :  { %3212 = vmatprep.subr.mxu0 %v3594_v0 }
0x1d88   :  { %3213 = vmatpush3.msra.mxu0 %v2757_v30 }
0x1d89   :  { %3215 = vmatmul.mubr.msk.f32.vlgmr.msra.gmra.mrb[12].mxu0 %vm2759_vm4, %v2547_v31  ;;  %3314 = vmatprep.subr.bf16.mxu0 %v3597_v32 }
0x1d8a   :  { %3227 = vmatprep.mubr.msk.f32.mxu0 %vm3595_vm1, %v3594_v0  ;;  %3316 = vmatpush3.bf16.msra.mxu0 %v3315_v36 }
0x1d8b   :  { %3317 = vmatprep.subr.bf16.mxu0 %v3597_v32 }
0x1d8e   :  { %3319 = vmatpush3.bf16.msra.mxu0 %v3318_v40 }
0x1d8f   :  { %3225 = vmatprep.subr.mxu0 %v3594_v0 }
0x1d92   :  { %3226 = vmatpush3.msra.mxu0 %v2752_v41 }
0x1e52   :  { %v2743_v43 = vpop.f32.mrb[10].mxu0 }
0x1e53   :  { %v2744_v44 = vadd.f32 %v2972_v42, %v2743_v43  ;;  %v3203_v45 = vpop.f32.mrb[11].mxu0 }
0x1e55   :  { %3488 = vtanh.f32 %v2744_v44 }
0x1e5c   :  { %v2829_v46 = vpop.f32.mrb[12].mxu0 }
0x1e5d   :  { %v3216_v47 = vpop.f32.mrb[13].mxu0 }
0x1e5f   :  { %v3489_v33 = vpop.eup %3488 }
0x1e60   :  { %3228 = vmatmul.mubr.msk.f32.vlgmr.msra.gmra.mrb[14].mxu0 %vm2759_vm4, %v3489_v33 }
0x1f33   :  { %v2902_v32 = vpop.f32.mrb[14].mxu0 }
0x1f34   :  { %v2903_v49 = vadd.f32 %v2902_v32, %v2829_v46  ;;  %v3229_v50 = vpop.f32.mrb[15].mxu0 }
0x1f36   :  { %v2910_v52 = vadd.f32 %v2976_v48, %v2903_v49 }
0x1f38   :  { %3490 = vtanh.f32 %v2910_v52 }
0x1f42   :  { %v3491_v0 = vpop.eup %3490 }
0x1f43   :  { %2912 = vst [vmem:[#allocation8] sm:$0x3] %v3491_v0 }
0x1f44   :  { %3570 = shalt.err (!%p3567_p0)
}
0x1f45   :  { %s3571_s7 = scalar_lea.hbm %s3951_s3, 32 }
0x1f46   :  { %p3572_p1 = scmp.ne.s32.totalorder %s3951_s3, %s3571_s7  ;;  %p3575_p2 = scmp.lt.u32.totalorder %s3571_s7, %s3951_s3 }
0x1f48   :  { %p3577_p3 = pnand %p3575_p2, %p3572_p1 }
0x1f4a   :  { %3580 = shalt.err (!%p3577_p3)
}
0x1f4b   :  { %2922 = dma.vmem_to_hbm [thread:$0]  %s2920_s30, 32, %s3951_s3, [#allocation4]  }
0x1f4c   :  { %3585 = dma.done.wait [#allocation4], 32  }
0x1f4d   :  { %3586 = vsyncadd [#allocation4], 4294967264 }
0x1f4e   :  { %2926 = vsyncpa [#allocation3], 1 }
0x1f4f   :  { %2927 = vsyncpa [#allocation6], 1 }
0x1f50   :  { %2928 = vsyncpa [#allocation4], 1 }

</bundles_post_ra>
